<compile_context>
chip_gen: v7x
topology: tpu7x:2x2x1
jax: 0.10.0
libtpu: 0.0.40
codegen_flags: <defaults>
</compile_context>

<pallas_src>
import jax
import jax.numpy as jnp
from jax.experimental import pallas as pl
from jax.experimental.pallas import tpu as pltpu

INV_SQRT2 = 0.7071067811865476
BN_EPS = 1e-5


# ---------------------------------------------------------------------------
# Fused kernel: hoisted GRU input projection -> recurrence -> Linear + residual
#               -> BN1 -> Conv1x1 -> GELU -> Conv1x1 -> residual -> BN2
# ---------------------------------------------------------------------------
def fused_kernel(x_ref,                                       # (B, T, I) f32
                 wih_r_ref, wih_z_ref, wih_n_ref,             # (I, H) bf16 each
                 whh_r_ref, whh_z_ref, whh_n_ref,             # (H, H) bf16 each
                 bias_r_ref, bias_z_ref, bias_in_ref, bias_hn_ref,   # (1, H) f32
                 wlin_ref, blin_ref,                          # (H, I) bf16, (1, I) f32
                 g1_ref, be1_ref,                             # (1, I) f32
                 w1_ref, b1_ref,                              # (I, C) bf16, (1, C) f32
                 w2_ref, b2_ref,                              # (C, I) bf16, (1, I) f32
                 g2_ref, be2_ref,                             # (1, I) f32
                 out_ref, hfin_ref,                           # (B, T, I), (B, H) f32
                 hseq_ref):                                   # VMEM scratch (B, T, H)
    B, T, I = x_ref.shape
    H = whh_r_ref.shape[0]
    N = B * T

    x_f32 = x_ref[...]                          # (B, T, I) f32 (kept for residual)
    x2d = x_f32.reshape(N, I)                   # batch-major rows: b*T + t
    x_bf = x2d.astype(jnp.bfloat16)

    # ---- Hoisted input projection: one big matmul per gate, biases folded in. ----
    # r/z gates: b_ih + b_hh both folded; n gate: only b_ih (b_hh_n must stay under r*).
    gi_r = (jnp.dot(x_bf, wih_r_ref[...], preferred_element_type=jnp.float32)
            + bias_r_ref[...]).reshape(B, T, H)
    gi_z = (jnp.dot(x_bf, wih_z_ref[...], preferred_element_type=jnp.float32)
            + bias_z_ref[...]).reshape(B, T, H)
    gi_n = (jnp.dot(x_bf, wih_n_ref[...], preferred_element_type=jnp.float32)
            + bias_in_ref[...]).reshape(B, T, H)

    whh_r = whh_r_ref[...]
    whh_z = whh_z_ref[...]
    whh_n = whh_n_ref[...]
    bias_hn = bias_hn_ref[...]

    # ---- Serial recurrence (statically unrolled; only (B,H)@(H,H) matmuls inside). --
    h = jnp.zeros((B, H), jnp.float32)          # hx = None -> zeros (init in-kernel)
    for t in range(T):
        h_bf = h.astype(jnp.bfloat16)
        gh_r = jnp.dot(h_bf, whh_r, preferred_element_type=jnp.float32)
        gh_z = jnp.dot(h_bf, whh_z, preferred_element_type=jnp.float32)
        gh_n = jnp.dot(h_bf, whh_n, preferred_element_type=jnp.float32)
        r = jax.nn.sigmoid(gi_r[:, t, :] + gh_r)
        z = jax.nn.sigmoid(gi_z[:, t, :] + gh_z)
        n = jnp.tanh(gi_n[:, t, :] + r * (gh_n + bias_hn))
        h = (1.0 - z) * n + z * h
        hseq_ref[:, t:t + 1, :] = h.reshape(B, 1, H)
    hfin_ref[...] = h

    # ---- Linear1 (+ dropout1 == identity) + residual, on the flattened slab. ----
    hs2d = hseq_ref[...].reshape(N, H)
    y = jnp.dot(hs2d.astype(jnp.bfloat16), wlin_ref[...],
                preferred_element_type=jnp.float32) + blin_ref[...]
    y = y + x2d

    # ---- BatchNorm1: per-channel stats over all N = B*T rows (biased var, f32). ----
    mean1 = jnp.mean(y, axis=0, keepdims=True)
    var1 = jnp.mean((y - mean1) ** 2, axis=0, keepdims=True)
    y = (y - mean1) * jax.lax.rsqrt(var1 + BN_EPS) * g1_ref[...] + be1_ref[...]

    res = y

    # ---- covd1 (1x1 conv == row-wise matmul I->C), exact GELU, covd2 (C->I). ----
    zz = jnp.dot(y.astype(jnp.bfloat16), w1_ref[...],
                 preferred_element_type=jnp.float32) + b1_ref[...]
    zz = 0.5 * zz * (1.0 + jax.lax.erf(zz * INV_SQRT2))
    zz = jnp.dot(zz.astype(jnp.bfloat16), w2_ref[...],
                 preferred_element_type=jnp.float32) + b2_ref[...]

    y = zz + res

    # ---- BatchNorm2 ----
    mean2 = jnp.mean(y, axis=0, keepdims=True)
    var2 = jnp.mean((y - mean2) ** 2, axis=0, keepdims=True)
    y = (y - mean2) * jax.lax.rsqrt(var2 + BN_EPS) * g2_ref[...] + be2_ref[...]

    out_ref[...] = y.reshape(B, T, I)           # batch-major -> directly (B, T, I)


# ---------------------------------------------------------------------------
# Wrapper
# ---------------------------------------------------------------------------
def _vmem_specs(n):
    return [pl.BlockSpec(memory_space=pltpu.MemorySpace.VMEM)] * n


@jax.jit
def new_rnn_cell_2_forward(x, params):
    """x: (B, T, I) float32.  Returns (out (B, T, I), hx_new (1, B, H))."""
    B, T, I = x.shape
    H = params["whh_t"].shape[0]
    bf = jnp.bfloat16

    # Per-gate weight split (gate order [r | z | n]) + bf16 cast; biases folded.
    wih_t, whh_t = params["wih_t"], params["whh_t"]
    b_ih, b_hh = params["b_ih"], params["b_hh"]
    wih_r, wih_z, wih_n = (wih_t[:, 0:H].astype(bf),
                           wih_t[:, H:2 * H].astype(bf),
                           wih_t[:, 2 * H:].astype(bf))
    whh_r, whh_z, whh_n = (whh_t[:, 0:H].astype(bf),
                           whh_t[:, H:2 * H].astype(bf),
                           whh_t[:, 2 * H:].astype(bf))
    bias_r = b_ih[:, 0:H] + b_hh[:, 0:H]
    bias_z = b_ih[:, H:2 * H] + b_hh[:, H:2 * H]
    bias_in = b_ih[:, 2 * H:]
    bias_hn = b_hh[:, 2 * H:]

    out, h_fin = pl.pallas_call(
        fused_kernel,
        out_shape=(jax.ShapeDtypeStruct((B, T, I), jnp.float32),
                   jax.ShapeDtypeStruct((B, H), jnp.float32)),
        in_specs=_vmem_specs(21),
        out_specs=tuple(_vmem_specs(2)),
        scratch_shapes=[pltpu.VMEM((B, T, H), jnp.float32)],
    )(x,
      wih_r, wih_z, wih_n, whh_r, whh_z, whh_n,
      bias_r, bias_z, bias_in, bias_hn,
      params["wlin_t"].astype(bf), params["b_lin"],
      params["gamma1"], params["beta1"],
      params["w1"].astype(bf), params["b1"],
      params["w2"].astype(bf), params["b2"],
      params["gamma2"], params["beta2"])

    return out, h_fin[None]                     # hx_new: (num_layers=1, B, H)


# ---------------------------------------------------------------------------
# Pure-JAX reference (identical math, incl. the bf16 matmul casts) for checking.
# ---------------------------------------------------------------------------
def reference_forward(x, params):
    B, T, I = x.shape
    H = params["whh_t"].shape[0]
    bf = jnp.bfloat16
    wih = params["wih_t"].astype(bf)
    whh = params["whh_t"].astype(bf)
    b_ih, b_hh = params["b_ih"], params["b_hh"]

    x_tm = jnp.transpose(x, (1, 0, 2))                            # (T, B, I)
    gi_all = (jnp.dot(x_tm.astype(bf).reshape(T * B, I), wih,
                      preferred_element_type=jnp.float32).reshape(T, B, 3 * H)
              + b_ih)

    def step(h, gi_t):
        gh = jnp.dot(h.astype(bf), whh, preferred_element_type=jnp.float32) + b_hh
        r = jax.nn.sigmoid(gi_t[:, :H] + gh[:, :H])
        z = jax.nn.sigmoid(gi_t[:, H:2 * H] + gh[:, H:2 * H])
        n = jnp.tanh(gi_t[:, 2 * H:] + r * gh[:, 2 * H:])
        h_new = (1.0 - z) * n + z * h
        return h_new, h_new

    h_fin, hs = jax.lax.scan(step, jnp.zeros((B, H), jnp.float32), gi_all)

    hs_bm = jnp.transpose(hs, (1, 0, 2)).reshape(B * T, H)        # batch-major rows
    x2d = x.reshape(B * T, I)

    y = (jnp.dot(hs_bm.astype(bf), params["wlin_t"].astype(bf),
                 preferred_element_type=jnp.float32)
         + params["b_lin"] + x2d)

    def bn(v, g, b):
        m = v.mean(0, keepdims=True)
        var = ((v - m) ** 2).mean(0, keepdims=True)
        return (v - m) * jax.lax.rsqrt(var + BN_EPS) * g + b

    yf = bn(y, params["gamma1"], params["beta1"])
    res = yf
    z1 = (jnp.dot(yf.astype(bf), params["w1"].astype(bf),
                  preferred_element_type=jnp.float32) + params["b1"])
    z1 = 0.5 * z1 * (1.0 + jax.lax.erf(z1 * INV_SQRT2))
    z2 = (jnp.dot(z1.astype(bf), params["w2"].astype(bf),
                  preferred_element_type=jnp.float32) + params["b2"])
    yf = bn(z2 + res, params["gamma2"], params["beta2"])
    out = yf.reshape(B, T, I)
    return out, h_fin[None]


# ---------------------------------------------------------------------------
def make_params(key, I, H, C):
    ks = jax.random.split(key, 12)
    f = jnp.float32
    return {
        # GRU (torch weight_ih_l0 is (3H, I); stored pre-transposed, gates [r|z|n])
        "wih_t": (0.1 * jax.random.normal(ks[0], (I, 3 * H))).astype(f),
        "whh_t": (0.1 * jax.random.normal(ks[1], (H, 3 * H))).astype(f),
        "b_ih": (0.1 * jax.random.normal(ks[2], (1, 3 * H))).astype(f),
        "b_hh": (0.1 * jax.random.normal(ks[3], (1, 3 * H))).astype(f),
        # linear1: Linear(H, I)  (stored transposed: (H, I))
        "wlin_t": (0.1 * jax.random.normal(ks[4], (H, I))).astype(f),
        "b_lin": (0.1 * jax.random.normal(ks[5], (1, I))).astype(f),
        # batch_norm1
        "gamma1": (1.0 + 0.05 * jax.random.normal(ks[6], (1, I))).astype(f),
        "beta1": (0.05 * jax.random.normal(ks[7], (1, I))).astype(f),
        # covd1: Conv1d(I, C, k=1)  -> (I, C) matmul weight
        "w1": (0.1 * jax.random.normal(ks[8], (I, C))).astype(f),
        "b1": (0.1 * jax.random.normal(ks[9], (1, C))).astype(f),
        # covd2: Conv1d(C, I, k=1)  -> (C, I)
        "w2": (0.1 * jax.random.normal(ks[10], (C, I))).astype(f),
        "b2": (0.1 * jax.random.normal(ks[11], (1, I))).astype(f),
        # batch_norm2 (torch default init: ones / zeros)
        "gamma2": jnp.ones((1, I), f),
        "beta2": jnp.zeros((1, I), f),
    }


if __name__ == "__main__":
    B, T, I, H, C = 2, 8, 8, 32, 16   # input=8, hidden=32, convd=16, dropout ignored

    key = jax.random.PRNGKey(0)
    k_x, k_p = jax.random.split(key)
    x = jax.random.normal(k_x, (B, T, I), jnp.float32)
    params = make_params(k_p, I, H, C)

    out, hx_new = new_rnn_cell_2_forward(x, params)
    out, hx_new = jax.block_until_ready((out, hx_new))

    ref_out, ref_hx = reference_forward(x, params)
    assert out.shape == (B, T, I) and hx_new.shape == (1, B, H)
    assert jnp.allclose(out, ref_out, atol=2e-3, rtol=2e-3)
    assert jnp.allclose(hx_new, ref_hx, atol=2e-3, rtol=2e-3)

    print("KERNEL_OK")
</pallas_src>

<mosaic_0001>
module attributes {stable_mosaic.version = 11 : i64} {
  func.func @fused_kernel(%arg0: memref<2x8x8xf32, #tpu.memory_space<vmem>>, %arg1: memref<8x32xbf16, #tpu.memory_space<vmem>>, %arg2: memref<8x32xbf16, #tpu.memory_space<vmem>>, %arg3: memref<8x32xbf16, #tpu.memory_space<vmem>>, %arg4: memref<32x32xbf16, #tpu.memory_space<vmem>>, %arg5: memref<32x32xbf16, #tpu.memory_space<vmem>>, %arg6: memref<32x32xbf16, #tpu.memory_space<vmem>>, %arg7: memref<1x32xf32, #tpu.memory_space<vmem>>, %arg8: memref<1x32xf32, #tpu.memory_space<vmem>>, %arg9: memref<1x32xf32, #tpu.memory_space<vmem>>, %arg10: memref<1x32xf32, #tpu.memory_space<vmem>>, %arg11: memref<32x8xbf16, #tpu.memory_space<vmem>>, %arg12: memref<1x8xf32, #tpu.memory_space<vmem>>, %arg13: memref<1x8xf32, #tpu.memory_space<vmem>>, %arg14: memref<1x8xf32, #tpu.memory_space<vmem>>, %arg15: memref<8x16xbf16, #tpu.memory_space<vmem>>, %arg16: memref<1x16xf32, #tpu.memory_space<vmem>>, %arg17: memref<16x8xbf16, #tpu.memory_space<vmem>>, %arg18: memref<1x8xf32, #tpu.memory_space<vmem>>, %arg19: memref<1x8xf32, #tpu.memory_space<vmem>>, %arg20: memref<1x8xf32, #tpu.memory_space<vmem>>, %arg21: memref<2x8x8xf32, #tpu.memory_space<vmem>>, %arg22: memref<2x32xf32, #tpu.memory_space<vmem>>, %arg23: memref<2x8x32xf32, #tpu.memory_space<vmem>>) attributes {dimension_semantics = [], scalar_prefetch = 0 : i64, scratch_operands = 1 : i64, tpu.core_type = #tpu.core_type<tc>} {
    %c0 = arith.constant 0 : index
    %c0_0 = arith.constant 0 : index
    %c0_1 = arith.constant 0 : index
    %0 = vector.load %arg0[%c0, %c0_0, %c0_1] : memref<2x8x8xf32, #tpu.memory_space<vmem>>, vector<2x8x8xf32>
    %1 = vector.shape_cast %0 : vector<2x8x8xf32> to vector<16x8xf32>
    %2 = arith.truncf %1 : vector<16x8xf32> to vector<16x8xbf16>
    %c0_2 = arith.constant 0 : index
    %c0_3 = arith.constant 0 : index
    %3 = vector.load %arg1[%c0_2, %c0_3] : memref<8x32xbf16, #tpu.memory_space<vmem>>, vector<8x32xbf16>
    %cst = arith.constant dense<0.000000e+00> : vector<16x32xf32>
    %4 = tpu.matmul %2, %3, %cst {dimension_numbers = #tpu.dot_dimension_numbers<[1], [0], [0], [1], [0, 0, 1, 1], [], []>} : vector<16x8xbf16>, vector<8x32xbf16>, vector<16x32xf32> -> vector<16x32xf32>
    %c0_4 = arith.constant 0 : index
    %c0_5 = arith.constant 0 : index
    %5 = vector.load %arg7[%c0_4, %c0_5] : memref<1x32xf32, #tpu.memory_space<vmem>>, vector<1x32xf32>
    %6 = vector.broadcast %5 : vector<1x32xf32> to vector<16x32xf32>
    %7 = arith.addf %4, %6 : vector<16x32xf32>
    %8 = vector.shape_cast %7 : vector<16x32xf32> to vector<2x8x32xf32>
    %c0_6 = arith.constant 0 : index
    %c0_7 = arith.constant 0 : index
    %9 = vector.load %arg2[%c0_6, %c0_7] : memref<8x32xbf16, #tpu.memory_space<vmem>>, vector<8x32xbf16>
    %cst_8 = arith.constant dense<0.000000e+00> : vector<16x32xf32>
    %10 = tpu.matmul %2, %9, %cst_8 {dimension_numbers = #tpu.dot_dimension_numbers<[1], [0], [0], [1], [0, 0, 1, 1], [], []>} : vector<16x8xbf16>, vector<8x32xbf16>, vector<16x32xf32> -> vector<16x32xf32>
    %c0_9 = arith.constant 0 : index
    %c0_10 = arith.constant 0 : index
    %11 = vector.load %arg8[%c0_9, %c0_10] : memref<1x32xf32, #tpu.memory_space<vmem>>, vector<1x32xf32>
    %12 = vector.broadcast %11 : vector<1x32xf32> to vector<16x32xf32>
    %13 = arith.addf %10, %12 : vector<16x32xf32>
    %14 = vector.shape_cast %13 : vector<16x32xf32> to vector<2x8x32xf32>
    %c0_11 = arith.constant 0 : index
    %c0_12 = arith.constant 0 : index
    %15 = vector.load %arg3[%c0_11, %c0_12] : memref<8x32xbf16, #tpu.memory_space<vmem>>, vector<8x32xbf16>
    %cst_13 = arith.constant dense<0.000000e+00> : vector<16x32xf32>
    %16 = tpu.matmul %2, %15, %cst_13 {dimension_numbers = #tpu.dot_dimension_numbers<[1], [0], [0], [1], [0, 0, 1, 1], [], []>} : vector<16x8xbf16>, vector<8x32xbf16>, vector<16x32xf32> -> vector<16x32xf32>
    %c0_14 = arith.constant 0 : index
    %c0_15 = arith.constant 0 : index
    %17 = vector.load %arg9[%c0_14, %c0_15] : memref<1x32xf32, #tpu.memory_space<vmem>>, vector<1x32xf32>
    %18 = vector.broadcast %17 : vector<1x32xf32> to vector<16x32xf32>
    %19 = arith.addf %16, %18 : vector<16x32xf32>
    %20 = vector.shape_cast %19 : vector<16x32xf32> to vector<2x8x32xf32>
    %c0_16 = arith.constant 0 : index
    %c0_17 = arith.constant 0 : index
    %21 = vector.load %arg4[%c0_16, %c0_17] : memref<32x32xbf16, #tpu.memory_space<vmem>>, vector<32x32xbf16>
    %c0_18 = arith.constant 0 : index
    %c0_19 = arith.constant 0 : index
    %22 = vector.load %arg5[%c0_18, %c0_19] : memref<32x32xbf16, #tpu.memory_space<vmem>>, vector<32x32xbf16>
    %c0_20 = arith.constant 0 : index
    %c0_21 = arith.constant 0 : index
    %23 = vector.load %arg6[%c0_20, %c0_21] : memref<32x32xbf16, #tpu.memory_space<vmem>>, vector<32x32xbf16>
    %c0_22 = arith.constant 0 : index
    %c0_23 = arith.constant 0 : index
    %24 = vector.load %arg10[%c0_22, %c0_23] : memref<1x32xf32, #tpu.memory_space<vmem>>, vector<1x32xf32>
    %cst_24 = arith.constant 0.000000e+00 : f32
    %25 = vector.broadcast %cst_24 : f32 to vector<2x32xf32>
    %26 = arith.truncf %25 : vector<2x32xf32> to vector<2x32xbf16>
    %cst_25 = arith.constant dense<0.000000e+00> : vector<2x32xf32>
    %27 = tpu.matmul %26, %21, %cst_25 {dimension_numbers = #tpu.dot_dimension_numbers<[1], [0], [0], [1], [0, 0, 1, 1], [], []>} : vector<2x32xbf16>, vector<32x32xbf16>, vector<2x32xf32> -> vector<2x32xf32>
    %cst_26 = arith.constant dense<0.000000e+00> : vector<2x32xf32>
    %28 = tpu.matmul %26, %22, %cst_26 {dimension_numbers = #tpu.dot_dimension_numbers<[1], [0], [0], [1], [0, 0, 1, 1], [], []>} : vector<2x32xbf16>, vector<32x32xbf16>, vector<2x32xf32> -> vector<2x32xf32>
    %cst_27 = arith.constant dense<0.000000e+00> : vector<2x32xf32>
    %29 = tpu.matmul %26, %23, %cst_27 {dimension_numbers = #tpu.dot_dimension_numbers<[1], [0], [0], [1], [0, 0, 1, 1], [], []>} : vector<2x32xbf16>, vector<32x32xbf16>, vector<2x32xf32> -> vector<2x32xf32>
    %30 = vector.extract_strided_slice %8 {offsets = [0, 0, 0], sizes = [2, 1, 32], strides = [1, 1, 1]} : vector<2x8x32xf32> to vector<2x1x32xf32>
    %31 = vector.shape_cast %30 : vector<2x1x32xf32> to vector<2x32xf32>
    %32 = arith.addf %31, %27 : vector<2x32xf32>
    %33 = arith.negf %32 : vector<2x32xf32>
    %34 = math.exp %33 : vector<2x32xf32>
    %cst_28 = arith.constant 1.000000e+00 : f32
    %35 = vector.broadcast %cst_28 : f32 to vector<2x32xf32>
    %36 = arith.addf %35, %34 : vector<2x32xf32>
    %37 = arith.divf %35, %36 : vector<2x32xf32>
    %38 = vector.extract_strided_slice %14 {offsets = [0, 0, 0], sizes = [2, 1, 32], strides = [1, 1, 1]} : vector<2x8x32xf32> to vector<2x1x32xf32>
    %39 = vector.shape_cast %38 : vector<2x1x32xf32> to vector<2x32xf32>
    %40 = arith.addf %39, %28 : vector<2x32xf32>
    %41 = arith.negf %40 : vector<2x32xf32>
    %42 = math.exp %41 : vector<2x32xf32>
    %cst_29 = arith.constant 1.000000e+00 : f32
    %43 = vector.broadcast %cst_29 : f32 to vector<2x32xf32>
    %44 = arith.addf %43, %42 : vector<2x32xf32>
    %45 = arith.divf %43, %44 : vector<2x32xf32>
    %46 = vector.extract_strided_slice %20 {offsets = [0, 0, 0], sizes = [2, 1, 32], strides = [1, 1, 1]} : vector<2x8x32xf32> to vector<2x1x32xf32>
    %47 = vector.shape_cast %46 : vector<2x1x32xf32> to vector<2x32xf32>
    %48 = vector.broadcast %24 : vector<1x32xf32> to vector<2x32xf32>
    %49 = arith.addf %29, %48 : vector<2x32xf32>
    %50 = arith.mulf %37, %49 : vector<2x32xf32>
    %51 = arith.addf %47, %50 : vector<2x32xf32>
    %52 = math.tanh %51 : vector<2x32xf32>
    %cst_30 = arith.constant 1.000000e+00 : f32
    %53 = vector.broadcast %cst_30 : f32 to vector<2x32xf32>
    %54 = arith.subf %53, %45 : vector<2x32xf32>
    %55 = arith.mulf %54, %52 : vector<2x32xf32>
    %56 = arith.mulf %45, %25 : vector<2x32xf32>
    %57 = arith.addf %55, %56 : vector<2x32xf32>
    %58 = vector.shape_cast %57 : vector<2x32xf32> to vector<2x1x32xf32>
    %c0_31 = arith.constant 0 : index
    %c0_32 = arith.constant 0 : index
    %c0_33 = arith.constant 0 : index
    %59 = vector.load %arg23[%c0_31, %c0_32, %c0_33] : memref<2x8x32xf32, #tpu.memory_space<vmem>>, vector<2x1x32xf32>
    tpu.vector_store %arg23[%c0_31, %c0_32, %c0_33], %58 {strides = array<i32>} : memref<2x8x32xf32, #tpu.memory_space<vmem>>, vector<2x1x32xf32>,
    %60 = arith.truncf %57 : vector<2x32xf32> to vector<2x32xbf16>
    %cst_34 = arith.constant dense<0.000000e+00> : vector<2x32xf32>
    %61 = tpu.matmul %60, %21, %cst_34 {dimension_numbers = #tpu.dot_dimension_numbers<[1], [0], [0], [1], [0, 0, 1, 1], [], []>} : vector<2x32xbf16>, vector<32x32xbf16>, vector<2x32xf32> -> vector<2x32xf32>
    %cst_35 = arith.constant dense<0.000000e+00> : vector<2x32xf32>
    %62 = tpu.matmul %60, %22, %cst_35 {dimension_numbers = #tpu.dot_dimension_numbers<[1], [0], [0], [1], [0, 0, 1, 1], [], []>} : vector<2x32xbf16>, vector<32x32xbf16>, vector<2x32xf32> -> vector<2x32xf32>
    %cst_36 = arith.constant dense<0.000000e+00> : vector<2x32xf32>
    %63 = tpu.matmul %60, %23, %cst_36 {dimension_numbers = #tpu.dot_dimension_numbers<[1], [0], [0], [1], [0, 0, 1, 1], [], []>} : vector<2x32xbf16>, vector<32x32xbf16>, vector<2x32xf32> -> vector<2x32xf32>
    %64 = vector.extract_strided_slice %8 {offsets = [0, 1, 0], sizes = [2, 1, 32], strides = [1, 1, 1]} : vector<2x8x32xf32> to vector<2x1x32xf32>
    %65 = vector.shape_cast %64 : vector<2x1x32xf32> to vector<2x32xf32>
    %66 = arith.addf %65, %61 : vector<2x32xf32>
    %67 = arith.negf %66 : vector<2x32xf32>
    %68 = math.exp %67 : vector<2x32xf32>
    %cst_37 = arith.constant 1.000000e+00 : f32
    %69 = vector.broadcast %cst_37 : f32 to vector<2x32xf32>
    %70 = arith.addf %69, %68 : vector<2x32xf32>
    %71 = arith.divf %69, %70 : vector<2x32xf32>
    %72 = vector.extract_strided_slice %14 {offsets = [0, 1, 0], sizes = [2, 1, 32], strides = [1, 1, 1]} : vector<2x8x32xf32> to vector<2x1x32xf32>
    %73 = vector.shape_cast %72 : vector<2x1x32xf32> to vector<2x32xf32>
    %74 = arith.addf %73, %62 : vector<2x32xf32>
    %75 = arith.negf %74 : vector<2x32xf32>
    %76 = math.exp %75 : vector<2x32xf32>
    %cst_38 = arith.constant 1.000000e+00 : f32
    %77 = vector.broadcast %cst_38 : f32 to vector<2x32xf32>
    %78 = arith.addf %77, %76 : vector<2x32xf32>
    %79 = arith.divf %77, %78 : vector<2x32xf32>
    %80 = vector.extract_strided_slice %20 {offsets = [0, 1, 0], sizes = [2, 1, 32], strides = [1, 1, 1]} : vector<2x8x32xf32> to vector<2x1x32xf32>
    %81 = vector.shape_cast %80 : vector<2x1x32xf32> to vector<2x32xf32>
    %82 = vector.broadcast %24 : vector<1x32xf32> to vector<2x32xf32>
    %83 = arith.addf %63, %82 : vector<2x32xf32>
    %84 = arith.mulf %71, %83 : vector<2x32xf32>
    %85 = arith.addf %81, %84 : vector<2x32xf32>
    %86 = math.tanh %85 : vector<2x32xf32>
    %cst_39 = arith.constant 1.000000e+00 : f32
    %87 = vector.broadcast %cst_39 : f32 to vector<2x32xf32>
    %88 = arith.subf %87, %79 : vector<2x32xf32>
    %89 = arith.mulf %88, %86 : vector<2x32xf32>
    %90 = arith.mulf %79, %57 : vector<2x32xf32>
    %91 = arith.addf %89, %90 : vector<2x32xf32>
    %92 = vector.shape_cast %91 : vector<2x32xf32> to vector<2x1x32xf32>
    %c0_40 = arith.constant 0 : index
    %c1 = arith.constant 1 : index
    %c0_41 = arith.constant 0 : index
    %93 = vector.load %arg23[%c0_40, %c1, %c0_41] : memref<2x8x32xf32, #tpu.memory_space<vmem>>, vector<2x1x32xf32>
    tpu.vector_store %arg23[%c0_40, %c1, %c0_41], %92 {strides = array<i32>} : memref<2x8x32xf32, #tpu.memory_space<vmem>>, vector<2x1x32xf32>,
    %94 = arith.truncf %91 : vector<2x32xf32> to vector<2x32xbf16>
    %cst_42 = arith.constant dense<0.000000e+00> : vector<2x32xf32>
    %95 = tpu.matmul %94, %21, %cst_42 {dimension_numbers = #tpu.dot_dimension_numbers<[1], [0], [0], [1], [0, 0, 1, 1], [], []>} : vector<2x32xbf16>, vector<32x32xbf16>, vector<2x32xf32> -> vector<2x32xf32>
    %cst_43 = arith.constant dense<0.000000e+00> : vector<2x32xf32>
    %96 = tpu.matmul %94, %22, %cst_43 {dimension_numbers = #tpu.dot_dimension_numbers<[1], [0], [0], [1], [0, 0, 1, 1], [], []>} : vector<2x32xbf16>, vector<32x32xbf16>, vector<2x32xf32> -> vector<2x32xf32>
    %cst_44 = arith.constant dense<0.000000e+00> : vector<2x32xf32>
    %97 = tpu.matmul %94, %23, %cst_44 {dimension_numbers = #tpu.dot_dimension_numbers<[1], [0], [0], [1], [0, 0, 1, 1], [], []>} : vector<2x32xbf16>, vector<32x32xbf16>, vector<2x32xf32> -> vector<2x32xf32>
    %98 = vector.extract_strided_slice %8 {offsets = [0, 2, 0], sizes = [2, 1, 32], strides = [1, 1, 1]} : vector<2x8x32xf32> to vector<2x1x32xf32>
    %99 = vector.shape_cast %98 : vector<2x1x32xf32> to vector<2x32xf32>
    %100 = arith.addf %99, %95 : vector<2x32xf32>
    %101 = arith.negf %100 : vector<2x32xf32>
    %102 = math.exp %101 : vector<2x32xf32>
    %cst_45 = arith.constant 1.000000e+00 : f32
    %103 = vector.broadcast %cst_45 : f32 to vector<2x32xf32>
    %104 = arith.addf %103, %102 : vector<2x32xf32>
    %105 = arith.divf %103, %104 : vector<2x32xf32>
    %106 = vector.extract_strided_slice %14 {offsets = [0, 2, 0], sizes = [2, 1, 32], strides = [1, 1, 1]} : vector<2x8x32xf32> to vector<2x1x32xf32>
    %107 = vector.shape_cast %106 : vector<2x1x32xf32> to vector<2x32xf32>
    %108 = arith.addf %107, %96 : vector<2x32xf32>
    %109 = arith.negf %108 : vector<2x32xf32>
    %110 = math.exp %109 : vector<2x32xf32>
    %cst_46 = arith.constant 1.000000e+00 : f32
    %111 = vector.broadcast %cst_46 : f32 to vector<2x32xf32>
    %112 = arith.addf %111, %110 : vector<2x32xf32>
    %113 = arith.divf %111, %112 : vector<2x32xf32>
    %114 = vector.extract_strided_slice %20 {offsets = [0, 2, 0], sizes = [2, 1, 32], strides = [1, 1, 1]} : vector<2x8x32xf32> to vector<2x1x32xf32>
    %115 = vector.shape_cast %114 : vector<2x1x32xf32> to vector<2x32xf32>
    %116 = vector.broadcast %24 : vector<1x32xf32> to vector<2x32xf32>
    %117 = arith.addf %97, %116 : vector<2x32xf32>
    %118 = arith.mulf %105, %117 : vector<2x32xf32>
    %119 = arith.addf %115, %118 : vector<2x32xf32>
    %120 = math.tanh %119 : vector<2x32xf32>
    %cst_47 = arith.constant 1.000000e+00 : f32
    %121 = vector.broadcast %cst_47 : f32 to vector<2x32xf32>
    %122 = arith.subf %121, %113 : vector<2x32xf32>
    %123 = arith.mulf %122, %120 : vector<2x32xf32>
    %124 = arith.mulf %113, %91 : vector<2x32xf32>
    %125 = arith.addf %123, %124 : vector<2x32xf32>
    %126 = vector.shape_cast %125 : vector<2x32xf32> to vector<2x1x32xf32>
    %c0_48 = arith.constant 0 : index
    %c2 = arith.constant 2 : index
    %c0_49 = arith.constant 0 : index
    %127 = vector.load %arg23[%c0_48, %c2, %c0_49] : memref<2x8x32xf32, #tpu.memory_space<vmem>>, vector<2x1x32xf32>
    tpu.vector_store %arg23[%c0_48, %c2, %c0_49], %126 {strides = array<i32>} : memref<2x8x32xf32, #tpu.memory_space<vmem>>, vector<2x1x32xf32>,
    %128 = arith.truncf %125 : vector<2x32xf32> to vector<2x32xbf16>
    %cst_50 = arith.constant dense<0.000000e+00> : vector<2x32xf32>
    %129 = tpu.matmul %128, %21, %cst_50 {dimension_numbers = #tpu.dot_dimension_numbers<[1], [0], [0], [1], [0, 0, 1, 1], [], []>} : vector<2x32xbf16>, vector<32x32xbf16>, vector<2x32xf32> -> vector<2x32xf32>
    %cst_51 = arith.constant dense<0.000000e+00> : vector<2x32xf32>
    %130 = tpu.matmul %128, %22, %cst_51 {dimension_numbers = #tpu.dot_dimension_numbers<[1], [0], [0], [1], [0, 0, 1, 1], [], []>} : vector<2x32xbf16>, vector<32x32xbf16>, vector<2x32xf32> -> vector<2x32xf32>
    %cst_52 = arith.constant dense<0.000000e+00> : vector<2x32xf32>
    %131 = tpu.matmul %128, %23, %cst_52 {dimension_numbers = #tpu.dot_dimension_numbers<[1], [0], [0], [1], [0, 0, 1, 1], [], []>} : vector<2x32xbf16>, vector<32x32xbf16>, vector<2x32xf32> -> vector<2x32xf32>
    %132 = vector.extract_strided_slice %8 {offsets = [0, 3, 0], sizes = [2, 1, 32], strides = [1, 1, 1]} : vector<2x8x32xf32> to vector<2x1x32xf32>
    %133 = vector.shape_cast %132 : vector<2x1x32xf32> to vector<2x32xf32>
    %134 = arith.addf %133, %129 : vector<2x32xf32>
    %135 = arith.negf %134 : vector<2x32xf32>
    %136 = math.exp %135 : vector<2x32xf32>
    %cst_53 = arith.constant 1.000000e+00 : f32
    %137 = vector.broadcast %cst_53 : f32 to vector<2x32xf32>
    %138 = arith.addf %137, %136 : vector<2x32xf32>
    %139 = arith.divf %137, %138 : vector<2x32xf32>
    %140 = vector.extract_strided_slice %14 {offsets = [0, 3, 0], sizes = [2, 1, 32], strides = [1, 1, 1]} : vector<2x8x32xf32> to vector<2x1x32xf32>
    %141 = vector.shape_cast %140 : vector<2x1x32xf32> to vector<2x32xf32>
    %142 = arith.addf %141, %130 : vector<2x32xf32>
    %143 = arith.negf %142 : vector<2x32xf32>
    %144 = math.exp %143 : vector<2x32xf32>
    %cst_54 = arith.constant 1.000000e+00 : f32
    %145 = vector.broadcast %cst_54 : f32 to vector<2x32xf32>
    %146 = arith.addf %145, %144 : vector<2x32xf32>
    %147 = arith.divf %145, %146 : vector<2x32xf32>
    %148 = vector.extract_strided_slice %20 {offsets = [0, 3, 0], sizes = [2, 1, 32], strides = [1, 1, 1]} : vector<2x8x32xf32> to vector<2x1x32xf32>
    %149 = vector.shape_cast %148 : vector<2x1x32xf32> to vector<2x32xf32>
    %150 = vector.broadcast %24 : vector<1x32xf32> to vector<2x32xf32>
    %151 = arith.addf %131, %150 : vector<2x32xf32>
    %152 = arith.mulf %139, %151 : vector<2x32xf32>
    %153 = arith.addf %149, %152 : vector<2x32xf32>
    %154 = math.tanh %153 : vector<2x32xf32>
    %cst_55 = arith.constant 1.000000e+00 : f32
    %155 = vector.broadcast %cst_55 : f32 to vector<2x32xf32>
    %156 = arith.subf %155, %147 : vector<2x32xf32>
    %157 = arith.mulf %156, %154 : vector<2x32xf32>
    %158 = arith.mulf %147, %125 : vector<2x32xf32>
    %159 = arith.addf %157, %158 : vector<2x32xf32>
    %160 = vector.shape_cast %159 : vector<2x32xf32> to vector<2x1x32xf32>
    %c0_56 = arith.constant 0 : index
    %c3 = arith.constant 3 : index
    %c0_57 = arith.constant 0 : index
    %161 = vector.load %arg23[%c0_56, %c3, %c0_57] : memref<2x8x32xf32, #tpu.memory_space<vmem>>, vector<2x1x32xf32>
    tpu.vector_store %arg23[%c0_56, %c3, %c0_57], %160 {strides = array<i32>} : memref<2x8x32xf32, #tpu.memory_space<vmem>>, vector<2x1x32xf32>,
    %162 = arith.truncf %159 : vector<2x32xf32> to vector<2x32xbf16>
    %cst_58 = arith.constant dense<0.000000e+00> : vector<2x32xf32>
    %163 = tpu.matmul %162, %21, %cst_58 {dimension_numbers = #tpu.dot_dimension_numbers<[1], [0], [0], [1], [0, 0, 1, 1], [], []>} : vector<2x32xbf16>, vector<32x32xbf16>, vector<2x32xf32> -> vector<2x32xf32>
    %cst_59 = arith.constant dense<0.000000e+00> : vector<2x32xf32>
    %164 = tpu.matmul %162, %22, %cst_59 {dimension_numbers = #tpu.dot_dimension_numbers<[1], [0], [0], [1], [0, 0, 1, 1], [], []>} : vector<2x32xbf16>, vector<32x32xbf16>, vector<2x32xf32> -> vector<2x32xf32>
    %cst_60 = arith.constant dense<0.000000e+00> : vector<2x32xf32>
    %165 = tpu.matmul %162, %23, %cst_60 {dimension_numbers = #tpu.dot_dimension_numbers<[1], [0], [0], [1], [0, 0, 1, 1], [], []>} : vector<2x32xbf16>, vector<32x32xbf16>, vector<2x32xf32> -> vector<2x32xf32>
    %166 = vector.extract_strided_slice %8 {offsets = [0, 4, 0], sizes = [2, 1, 32], strides = [1, 1, 1]} : vector<2x8x32xf32> to vector<2x1x32xf32>
    %167 = vector.shape_cast %166 : vector<2x1x32xf32> to vector<2x32xf32>
    %168 = arith.addf %167, %163 : vector<2x32xf32>
    %169 = arith.negf %168 : vector<2x32xf32>
    %170 = math.exp %169 : vector<2x32xf32>
    %cst_61 = arith.constant 1.000000e+00 : f32
    %171 = vector.broadcast %cst_61 : f32 to vector<2x32xf32>
    %172 = arith.addf %171, %170 : vector<2x32xf32>
    %173 = arith.divf %171, %172 : vector<2x32xf32>
    %174 = vector.extract_strided_slice %14 {offsets = [0, 4, 0], sizes = [2, 1, 32], strides = [1, 1, 1]} : vector<2x8x32xf32> to vector<2x1x32xf32>
    %175 = vector.shape_cast %174 : vector<2x1x32xf32> to vector<2x32xf32>
    %176 = arith.addf %175, %164 : vector<2x32xf32>
    %177 = arith.negf %176 : vector<2x32xf32>
    %178 = math.exp %177 : vector<2x32xf32>
    %cst_62 = arith.constant 1.000000e+00 : f32
    %179 = vector.broadcast %cst_62 : f32 to vector<2x32xf32>
    %180 = arith.addf %179, %178 : vector<2x32xf32>
    %181 = arith.divf %179, %180 : vector<2x32xf32>
    %182 = vector.extract_strided_slice %20 {offsets = [0, 4, 0], sizes = [2, 1, 32], strides = [1, 1, 1]} : vector<2x8x32xf32> to vector<2x1x32xf32>
    %183 = vector.shape_cast %182 : vector<2x1x32xf32> to vector<2x32xf32>
    %184 = vector.broadcast %24 : vector<1x32xf32> to vector<2x32xf32>
    %185 = arith.addf %165, %184 : vector<2x32xf32>
    %186 = arith.mulf %173, %185 : vector<2x32xf32>
    %187 = arith.addf %183, %186 : vector<2x32xf32>
    %188 = math.tanh %187 : vector<2x32xf32>
    %cst_63 = arith.constant 1.000000e+00 : f32
    %189 = vector.broadcast %cst_63 : f32 to vector<2x32xf32>
    %190 = arith.subf %189, %181 : vector<2x32xf32>
    %191 = arith.mulf %190, %188 : vector<2x32xf32>
    %192 = arith.mulf %181, %159 : vector<2x32xf32>
    %193 = arith.addf %191, %192 : vector<2x32xf32>
    %194 = vector.shape_cast %193 : vector<2x32xf32> to vector<2x1x32xf32>
    %c0_64 = arith.constant 0 : index
    %c4 = arith.constant 4 : index
    %c0_65 = arith.constant 0 : index
    %195 = vector.load %arg23[%c0_64, %c4, %c0_65] : memref<2x8x32xf32, #tpu.memory_space<vmem>>, vector<2x1x32xf32>
    tpu.vector_store %arg23[%c0_64, %c4, %c0_65], %194 {strides = array<i32>} : memref<2x8x32xf32, #tpu.memory_space<vmem>>, vector<2x1x32xf32>,
    %196 = arith.truncf %193 : vector<2x32xf32> to vector<2x32xbf16>
    %cst_66 = arith.constant dense<0.000000e+00> : vector<2x32xf32>
    %197 = tpu.matmul %196, %21, %cst_66 {dimension_numbers = #tpu.dot_dimension_numbers<[1], [0], [0], [1], [0, 0, 1, 1], [], []>} : vector<2x32xbf16>, vector<32x32xbf16>, vector<2x32xf32> -> vector<2x32xf32>
    %cst_67 = arith.constant dense<0.000000e+00> : vector<2x32xf32>
    %198 = tpu.matmul %196, %22, %cst_67 {dimension_numbers = #tpu.dot_dimension_numbers<[1], [0], [0], [1], [0, 0, 1, 1], [], []>} : vector<2x32xbf16>, vector<32x32xbf16>, vector<2x32xf32> -> vector<2x32xf32>
    %cst_68 = arith.constant dense<0.000000e+00> : vector<2x32xf32>
    %199 = tpu.matmul %196, %23, %cst_68 {dimension_numbers = #tpu.dot_dimension_numbers<[1], [0], [0], [1], [0, 0, 1, 1], [], []>} : vector<2x32xbf16>, vector<32x32xbf16>, vector<2x32xf32> -> vector<2x32xf32>
    %200 = vector.extract_strided_slice %8 {offsets = [0, 5, 0], sizes = [2, 1, 32], strides = [1, 1, 1]} : vector<2x8x32xf32> to vector<2x1x32xf32>
    %201 = vector.shape_cast %200 : vector<2x1x32xf32> to vector<2x32xf32>
    %202 = arith.addf %201, %197 : vector<2x32xf32>
    %203 = arith.negf %202 : vector<2x32xf32>
    %204 = math.exp %203 : vector<2x32xf32>
    %cst_69 = arith.constant 1.000000e+00 : f32
    %205 = vector.broadcast %cst_69 : f32 to vector<2x32xf32>
    %206 = arith.addf %205, %204 : vector<2x32xf32>
    %207 = arith.divf %205, %206 : vector<2x32xf32>
    %208 = vector.extract_strided_slice %14 {offsets = [0, 5, 0], sizes = [2, 1, 32], strides = [1, 1, 1]} : vector<2x8x32xf32> to vector<2x1x32xf32>
    %209 = vector.shape_cast %208 : vector<2x1x32xf32> to vector<2x32xf32>
    %210 = arith.addf %209, %198 : vector<2x32xf32>
    %211 = arith.negf %210 : vector<2x32xf32>
    %212 = math.exp %211 : vector<2x32xf32>
    %cst_70 = arith.constant 1.000000e+00 : f32
    %213 = vector.broadcast %cst_70 : f32 to vector<2x32xf32>
    %214 = arith.addf %213, %212 : vector<2x32xf32>
    %215 = arith.divf %213, %214 : vector<2x32xf32>
    %216 = vector.extract_strided_slice %20 {offsets = [0, 5, 0], sizes = [2, 1, 32], strides = [1, 1, 1]} : vector<2x8x32xf32> to vector<2x1x32xf32>
    %217 = vector.shape_cast %216 : vector<2x1x32xf32> to vector<2x32xf32>
    %218 = vector.broadcast %24 : vector<1x32xf32> to vector<2x32xf32>
    %219 = arith.addf %199, %218 : vector<2x32xf32>
    %220 = arith.mulf %207, %219 : vector<2x32xf32>
    %221 = arith.addf %217, %220 : vector<2x32xf32>
    %222 = math.tanh %221 : vector<2x32xf32>
    %cst_71 = arith.constant 1.000000e+00 : f32
    %223 = vector.broadcast %cst_71 : f32 to vector<2x32xf32>
    %224 = arith.subf %223, %215 : vector<2x32xf32>
    %225 = arith.mulf %224, %222 : vector<2x32xf32>
    %226 = arith.mulf %215, %193 : vector<2x32xf32>
    %227 = arith.addf %225, %226 : vector<2x32xf32>
    %228 = vector.shape_cast %227 : vector<2x32xf32> to vector<2x1x32xf32>
    %c0_72 = arith.constant 0 : index
    %c5 = arith.constant 5 : index
    %c0_73 = arith.constant 0 : index
    %229 = vector.load %arg23[%c0_72, %c5, %c0_73] : memref<2x8x32xf32, #tpu.memory_space<vmem>>, vector<2x1x32xf32>
    tpu.vector_store %arg23[%c0_72, %c5, %c0_73], %228 {strides = array<i32>} : memref<2x8x32xf32, #tpu.memory_space<vmem>>, vector<2x1x32xf32>,
    %230 = arith.truncf %227 : vector<2x32xf32> to vector<2x32xbf16>
    %cst_74 = arith.constant dense<0.000000e+00> : vector<2x32xf32>
    %231 = tpu.matmul %230, %21, %cst_74 {dimension_numbers = #tpu.dot_dimension_numbers<[1], [0], [0], [1], [0, 0, 1, 1], [], []>} : vector<2x32xbf16>, vector<32x32xbf16>, vector<2x32xf32> -> vector<2x32xf32>
    %cst_75 = arith.constant dense<0.000000e+00> : vector<2x32xf32>
    %232 = tpu.matmul %230, %22, %cst_75 {dimension_numbers = #tpu.dot_dimension_numbers<[1], [0], [0], [1], [0, 0, 1, 1], [], []>} : vector<2x32xbf16>, vector<32x32xbf16>, vector<2x32xf32> -> vector<2x32xf32>
    %cst_76 = arith.constant dense<0.000000e+00> : vector<2x32xf32>
    %233 = tpu.matmul %230, %23, %cst_76 {dimension_numbers = #tpu.dot_dimension_numbers<[1], [0], [0], [1], [0, 0, 1, 1], [], []>} : vector<2x32xbf16>, vector<32x32xbf16>, vector<2x32xf32> -> vector<2x32xf32>
    %234 = vector.extract_strided_slice %8 {offsets = [0, 6, 0], sizes = [2, 1, 32], strides = [1, 1, 1]} : vector<2x8x32xf32> to vector<2x1x32xf32>
    %235 = vector.shape_cast %234 : vector<2x1x32xf32> to vector<2x32xf32>
    %236 = arith.addf %235, %231 : vector<2x32xf32>
    %237 = arith.negf %236 : vector<2x32xf32>
    %238 = math.exp %237 : vector<2x32xf32>
    %cst_77 = arith.constant 1.000000e+00 : f32
    %239 = vector.broadcast %cst_77 : f32 to vector<2x32xf32>
    %240 = arith.addf %239, %238 : vector<2x32xf32>
    %241 = arith.divf %239, %240 : vector<2x32xf32>
    %242 = vector.extract_strided_slice %14 {offsets = [0, 6, 0], sizes = [2, 1, 32], strides = [1, 1, 1]} : vector<2x8x32xf32> to vector<2x1x32xf32>
    %243 = vector.shape_cast %242 : vector<2x1x32xf32> to vector<2x32xf32>
    %244 = arith.addf %243, %232 : vector<2x32xf32>
    %245 = arith.negf %244 : vector<2x32xf32>
    %246 = math.exp %245 : vector<2x32xf32>
    %cst_78 = arith.constant 1.000000e+00 : f32
    %247 = vector.broadcast %cst_78 : f32 to vector<2x32xf32>
    %248 = arith.addf %247, %246 : vector<2x32xf32>
    %249 = arith.divf %247, %248 : vector<2x32xf32>
    %250 = vector.extract_strided_slice %20 {offsets = [0, 6, 0], sizes = [2, 1, 32], strides = [1, 1, 1]} : vector<2x8x32xf32> to vector<2x1x32xf32>
    %251 = vector.shape_cast %250 : vector<2x1x32xf32> to vector<2x32xf32>
    %252 = vector.broadcast %24 : vector<1x32xf32> to vector<2x32xf32>
    %253 = arith.addf %233, %252 : vector<2x32xf32>
    %254 = arith.mulf %241, %253 : vector<2x32xf32>
    %255 = arith.addf %251, %254 : vector<2x32xf32>
    %256 = math.tanh %255 : vector<2x32xf32>
    %cst_79 = arith.constant 1.000000e+00 : f32
    %257 = vector.broadcast %cst_79 : f32 to vector<2x32xf32>
    %258 = arith.subf %257, %249 : vector<2x32xf32>
    %259 = arith.mulf %258, %256 : vector<2x32xf32>
    %260 = arith.mulf %249, %227 : vector<2x32xf32>
    %261 = arith.addf %259, %260 : vector<2x32xf32>
    %262 = vector.shape_cast %261 : vector<2x32xf32> to vector<2x1x32xf32>
    %c0_80 = arith.constant 0 : index
    %c6 = arith.constant 6 : index
    %c0_81 = arith.constant 0 : index
    %263 = vector.load %arg23[%c0_80, %c6, %c0_81] : memref<2x8x32xf32, #tpu.memory_space<vmem>>, vector<2x1x32xf32>
    tpu.vector_store %arg23[%c0_80, %c6, %c0_81], %262 {strides = array<i32>} : memref<2x8x32xf32, #tpu.memory_space<vmem>>, vector<2x1x32xf32>,
    %264 = arith.truncf %261 : vector<2x32xf32> to vector<2x32xbf16>
    %cst_82 = arith.constant dense<0.000000e+00> : vector<2x32xf32>
    %265 = tpu.matmul %264, %21, %cst_82 {dimension_numbers = #tpu.dot_dimension_numbers<[1], [0], [0], [1], [0, 0, 1, 1], [], []>} : vector<2x32xbf16>, vector<32x32xbf16>, vector<2x32xf32> -> vector<2x32xf32>
    %cst_83 = arith.constant dense<0.000000e+00> : vector<2x32xf32>
    %266 = tpu.matmul %264, %22, %cst_83 {dimension_numbers = #tpu.dot_dimension_numbers<[1], [0], [0], [1], [0, 0, 1, 1], [], []>} : vector<2x32xbf16>, vector<32x32xbf16>, vector<2x32xf32> -> vector<2x32xf32>
    %cst_84 = arith.constant dense<0.000000e+00> : vector<2x32xf32>
    %267 = tpu.matmul %264, %23, %cst_84 {dimension_numbers = #tpu.dot_dimension_numbers<[1], [0], [0], [1], [0, 0, 1, 1], [], []>} : vector<2x32xbf16>, vector<32x32xbf16>, vector<2x32xf32> -> vector<2x32xf32>
    %268 = vector.extract_strided_slice %8 {offsets = [0, 7, 0], sizes = [2, 1, 32], strides = [1, 1, 1]} : vector<2x8x32xf32> to vector<2x1x32xf32>
    %269 = vector.shape_cast %268 : vector<2x1x32xf32> to vector<2x32xf32>
    %270 = arith.addf %269, %265 : vector<2x32xf32>
    %271 = arith.negf %270 : vector<2x32xf32>
    %272 = math.exp %271 : vector<2x32xf32>
    %cst_85 = arith.constant 1.000000e+00 : f32
    %273 = vector.broadcast %cst_85 : f32 to vector<2x32xf32>
    %274 = arith.addf %273, %272 : vector<2x32xf32>
    %275 = arith.divf %273, %274 : vector<2x32xf32>
    %276 = vector.extract_strided_slice %14 {offsets = [0, 7, 0], sizes = [2, 1, 32], strides = [1, 1, 1]} : vector<2x8x32xf32> to vector<2x1x32xf32>
    %277 = vector.shape_cast %276 : vector<2x1x32xf32> to vector<2x32xf32>
    %278 = arith.addf %277, %266 : vector<2x32xf32>
    %279 = arith.negf %278 : vector<2x32xf32>
    %280 = math.exp %279 : vector<2x32xf32>
    %cst_86 = arith.constant 1.000000e+00 : f32
    %281 = vector.broadcast %cst_86 : f32 to vector<2x32xf32>
    %282 = arith.addf %281, %280 : vector<2x32xf32>
    %283 = arith.divf %281, %282 : vector<2x32xf32>
    %284 = vector.extract_strided_slice %20 {offsets = [0, 7, 0], sizes = [2, 1, 32], strides = [1, 1, 1]} : vector<2x8x32xf32> to vector<2x1x32xf32>
    %285 = vector.shape_cast %284 : vector<2x1x32xf32> to vector<2x32xf32>
    %286 = vector.broadcast %24 : vector<1x32xf32> to vector<2x32xf32>
    %287 = arith.addf %267, %286 : vector<2x32xf32>
    %288 = arith.mulf %275, %287 : vector<2x32xf32>
    %289 = arith.addf %285, %288 : vector<2x32xf32>
    %290 = math.tanh %289 : vector<2x32xf32>
    %cst_87 = arith.constant 1.000000e+00 : f32
    %291 = vector.broadcast %cst_87 : f32 to vector<2x32xf32>
    %292 = arith.subf %291, %283 : vector<2x32xf32>
    %293 = arith.mulf %292, %290 : vector<2x32xf32>
    %294 = arith.mulf %283, %261 : vector<2x32xf32>
    %295 = arith.addf %293, %294 : vector<2x32xf32>
    %296 = vector.shape_cast %295 : vector<2x32xf32> to vector<2x1x32xf32>
    %c0_88 = arith.constant 0 : index
    %c7 = arith.constant 7 : index
    %c0_89 = arith.constant 0 : index
    %297 = vector.load %arg23[%c0_88, %c7, %c0_89] : memref<2x8x32xf32, #tpu.memory_space<vmem>>, vector<2x1x32xf32>
    tpu.vector_store %arg23[%c0_88, %c7, %c0_89], %296 {strides = array<i32>} : memref<2x8x32xf32, #tpu.memory_space<vmem>>, vector<2x1x32xf32>,
    %c0_90 = arith.constant 0 : index
    %c0_91 = arith.constant 0 : index
    %298 = vector.load %arg22[%c0_90, %c0_91] : memref<2x32xf32, #tpu.memory_space<vmem>>, vector<2x32xf32>
    tpu.vector_store %arg22[%c0_90, %c0_91], %295 {strides = array<i32>} : memref<2x32xf32, #tpu.memory_space<vmem>>, vector<2x32xf32>,
    %c0_92 = arith.constant 0 : index
    %c0_93 = arith.constant 0 : index
    %c0_94 = arith.constant 0 : index
    %299 = vector.load %arg23[%c0_92, %c0_93, %c0_94] : memref<2x8x32xf32, #tpu.memory_space<vmem>>, vector<2x8x32xf32>
    %300 = vector.shape_cast %299 : vector<2x8x32xf32> to vector<16x32xf32>
    %301 = arith.truncf %300 : vector<16x32xf32> to vector<16x32xbf16>
    %c0_95 = arith.constant 0 : index
    %c0_96 = arith.constant 0 : index
    %302 = vector.load %arg11[%c0_95, %c0_96] : memref<32x8xbf16, #tpu.memory_space<vmem>>, vector<32x8xbf16>
    %cst_97 = arith.constant dense<0.000000e+00> : vector<16x8xf32>
    %303 = tpu.matmul %301, %302, %cst_97 {dimension_numbers = #tpu.dot_dimension_numbers<[1], [0], [0], [1], [0, 0, 1, 1], [], []>} : vector<16x32xbf16>, vector<32x8xbf16>, vector<16x8xf32> -> vector<16x8xf32>
    %c0_98 = arith.constant 0 : index
    %c0_99 = arith.constant 0 : index
    %304 = vector.load %arg12[%c0_98, %c0_99] : memref<1x8xf32, #tpu.memory_space<vmem>>, vector<1x8xf32>
    %305 = vector.broadcast %304 : vector<1x8xf32> to vector<16x8xf32>
    %306 = arith.addf %303, %305 : vector<16x8xf32>
    %307 = arith.addf %306, %1 : vector<16x8xf32>
    %cst_100 = arith.constant dense<0.000000e+00> : vector<8xf32>
    %308 = vector.multi_reduction <add>, %307, %cst_100 [0] : vector<16x8xf32> to vector<8xf32>
    %309 = vector.shape_cast %308 : vector<8xf32> to vector<1x8xf32>
    %cst_101 = arith.constant 1.600000e+01 : f32
    %310 = vector.broadcast %cst_101 : f32 to vector<1x8xf32>
    %311 = arith.divf %309, %310 : vector<1x8xf32>
    %312 = vector.broadcast %311 : vector<1x8xf32> to vector<16x8xf32>
    %313 = arith.subf %307, %312 : vector<16x8xf32>
    %314 = arith.mulf %313, %313 : vector<16x8xf32>
    %cst_102 = arith.constant dense<0.000000e+00> : vector<8xf32>
    %315 = vector.multi_reduction <add>, %314, %cst_102 [0] : vector<16x8xf32> to vector<8xf32>
    %316 = vector.shape_cast %315 : vector<8xf32> to vector<1x8xf32>
    %cst_103 = arith.constant 1.600000e+01 : f32
    %317 = vector.broadcast %cst_103 : f32 to vector<1x8xf32>
    %318 = arith.divf %316, %317 : vector<1x8xf32>
    %319 = vector.broadcast %311 : vector<1x8xf32> to vector<16x8xf32>
    %320 = arith.subf %307, %319 : vector<16x8xf32>
    %cst_104 = arith.constant 9.99999974E-6 : f32
    %321 = vector.broadcast %cst_104 : f32 to vector<1x8xf32>
    %322 = arith.addf %318, %321 : vector<1x8xf32>
    %323 = math.rsqrt %322 : vector<1x8xf32>
    %324 = vector.broadcast %323 : vector<1x8xf32> to vector<16x8xf32>
    %325 = arith.mulf %320, %324 : vector<16x8xf32>
    %c0_105 = arith.constant 0 : index
    %c0_106 = arith.constant 0 : index
    %326 = vector.load %arg13[%c0_105, %c0_106] : memref<1x8xf32, #tpu.memory_space<vmem>>, vector<1x8xf32>
    %327 = vector.broadcast %326 : vector<1x8xf32> to vector<16x8xf32>
    %328 = arith.mulf %325, %327 : vector<16x8xf32>
    %c0_107 = arith.constant 0 : index
    %c0_108 = arith.constant 0 : index
    %329 = vector.load %arg14[%c0_107, %c0_108] : memref<1x8xf32, #tpu.memory_space<vmem>>, vector<1x8xf32>
    %330 = vector.broadcast %329 : vector<1x8xf32> to vector<16x8xf32>
    %331 = arith.addf %328, %330 : vector<16x8xf32>
    %332 = arith.truncf %331 : vector<16x8xf32> to vector<16x8xbf16>
    %c0_109 = arith.constant 0 : index
    %c0_110 = arith.constant 0 : index
    %333 = vector.load %arg15[%c0_109, %c0_110] : memref<8x16xbf16, #tpu.memory_space<vmem>>, vector<8x16xbf16>
    %cst_111 = arith.constant dense<0.000000e+00> : vector<16x16xf32>
    %334 = tpu.matmul %332, %333, %cst_111 {dimension_numbers = #tpu.dot_dimension_numbers<[1], [0], [0], [1], [0, 0, 1, 1], [], []>} : vector<16x8xbf16>, vector<8x16xbf16>, vector<16x16xf32> -> vector<16x16xf32>
    %c0_112 = arith.constant 0 : index
    %c0_113 = arith.constant 0 : index
    %335 = vector.load %arg16[%c0_112, %c0_113] : memref<1x16xf32, #tpu.memory_space<vmem>>, vector<1x16xf32>
    %336 = vector.broadcast %335 : vector<1x16xf32> to vector<16x16xf32>
    %337 = arith.addf %334, %336 : vector<16x16xf32>
    %cst_114 = arith.constant 5.000000e-01 : f32
    %338 = vector.broadcast %cst_114 : f32 to vector<16x16xf32>
    %339 = arith.mulf %338, %337 : vector<16x16xf32>
    %cst_115 = arith.constant 0.707106769 : f32
    %340 = vector.broadcast %cst_115 : f32 to vector<16x16xf32>
    %341 = arith.mulf %337, %340 : vector<16x16xf32>
    %342 = math.erf %341 : vector<16x16xf32>
    %cst_116 = arith.constant 1.000000e+00 : f32
    %343 = vector.broadcast %cst_116 : f32 to vector<16x16xf32>
    %344 = arith.addf %343, %342 : vector<16x16xf32>
    %345 = arith.mulf %339, %344 : vector<16x16xf32>
    %346 = arith.truncf %345 : vector<16x16xf32> to vector<16x16xbf16>
    %c0_117 = arith.constant 0 : index
    %c0_118 = arith.constant 0 : index
    %347 = vector.load %arg17[%c0_117, %c0_118] : memref<16x8xbf16, #tpu.memory_space<vmem>>, vector<16x8xbf16>
    %cst_119 = arith.constant dense<0.000000e+00> : vector<16x8xf32>
    %348 = tpu.matmul %346, %347, %cst_119 {dimension_numbers = #tpu.dot_dimension_numbers<[1], [0], [0], [1], [0, 0, 1, 1], [], []>} : vector<16x16xbf16>, vector<16x8xbf16>, vector<16x8xf32> -> vector<16x8xf32>
    %c0_120 = arith.constant 0 : index
    %c0_121 = arith.constant 0 : index
    %349 = vector.load %arg18[%c0_120, %c0_121] : memref<1x8xf32, #tpu.memory_space<vmem>>, vector<1x8xf32>
    %350 = vector.broadcast %349 : vector<1x8xf32> to vector<16x8xf32>
    %351 = arith.addf %348, %350 : vector<16x8xf32>
    %352 = arith.addf %351, %331 : vector<16x8xf32>
    %cst_122 = arith.constant dense<0.000000e+00> : vector<8xf32>
    %353 = vector.multi_reduction <add>, %352, %cst_122 [0] : vector<16x8xf32> to vector<8xf32>
    %354 = vector.shape_cast %353 : vector<8xf32> to vector<1x8xf32>
    %cst_123 = arith.constant 1.600000e+01 : f32
    %355 = vector.broadcast %cst_123 : f32 to vector<1x8xf32>
    %356 = arith.divf %354, %355 : vector<1x8xf32>
    %357 = vector.broadcast %356 : vector<1x8xf32> to vector<16x8xf32>
    %358 = arith.subf %352, %357 : vector<16x8xf32>
    %359 = arith.mulf %358, %358 : vector<16x8xf32>
    %cst_124 = arith.constant dense<0.000000e+00> : vector<8xf32>
    %360 = vector.multi_reduction <add>, %359, %cst_124 [0] : vector<16x8xf32> to vector<8xf32>
    %361 = vector.shape_cast %360 : vector<8xf32> to vector<1x8xf32>
    %cst_125 = arith.constant 1.600000e+01 : f32
    %362 = vector.broadcast %cst_125 : f32 to vector<1x8xf32>
    %363 = arith.divf %361, %362 : vector<1x8xf32>
    %364 = vector.broadcast %356 : vector<1x8xf32> to vector<16x8xf32>
    %365 = arith.subf %352, %364 : vector<16x8xf32>
    %cst_126 = arith.constant 9.99999974E-6 : f32
    %366 = vector.broadcast %cst_126 : f32 to vector<1x8xf32>
    %367 = arith.addf %363, %366 : vector<1x8xf32>
    %368 = math.rsqrt %367 : vector<1x8xf32>
    %369 = vector.broadcast %368 : vector<1x8xf32> to vector<16x8xf32>
    %370 = arith.mulf %365, %369 : vector<16x8xf32>
    %c0_127 = arith.constant 0 : index
    %c0_128 = arith.constant 0 : index
    %371 = vector.load %arg19[%c0_127, %c0_128] : memref<1x8xf32, #tpu.memory_space<vmem>>, vector<1x8xf32>
    %372 = vector.broadcast %371 : vector<1x8xf32> to vector<16x8xf32>
    %373 = arith.mulf %370, %372 : vector<16x8xf32>
    %c0_129 = arith.constant 0 : index
    %c0_130 = arith.constant 0 : index
    %374 = vector.load %arg20[%c0_129, %c0_130] : memref<1x8xf32, #tpu.memory_space<vmem>>, vector<1x8xf32>
    %375 = vector.broadcast %374 : vector<1x8xf32> to vector<16x8xf32>
    %376 = arith.addf %373, %375 : vector<16x8xf32>
    %377 = vector.shape_cast %376 : vector<16x8xf32> to vector<2x8x8xf32>
    %c0_131 = arith.constant 0 : index
    %c0_132 = arith.constant 0 : index
    %c0_133 = arith.constant 0 : index
    %378 = vector.load %arg21[%c0_131, %c0_132, %c0_133] : memref<2x8x8xf32, #tpu.memory_space<vmem>>, vector<2x8x8xf32>
    tpu.vector_store %arg21[%c0_131, %c0_132, %c0_133], %377 {strides = array<i32>} : memref<2x8x8xf32, #tpu.memory_space<vmem>>, vector<2x8x8xf32>,
    return
  }
}

</mosaic_0001>

<bundles_post_ra>
// kernel: new_rnn_cell_2_forward.1
= control target key start
LH: loop header
LB: loop body
LE: loop exit
PB: predicated region body
PF: predicated region fallthrough
CT: control target
= control target key end

     0   :  { %s3471_s0 = inlined_call_operand.vmem [shape: f32[2,8,8], index: 0, kind: input, shape index: {}]   ;;  %s3472_s1 = inlined_call_operand.vmem [shape: bf16[8,32], index: 1, kind: input, shape index: {}]   ;;  %s3473_s2 = inlined_call_operand.vmem [shape: bf16[8,32], index: 2, kind: input, shape index: {}]   ;;  %s3474_s3 = inlined_call_operand.vmem [shape: bf16[8,32], index: 3, kind: input, shape index: {}]   ;;  %s3475_s4 = inlined_call_operand.vmem [shape: bf16[32,32], index: 4, kind: input, shape index: {}]   ;;  %s3476_s5 = inlined_call_operand.vmem [shape: bf16[32,32], index: 5, kind: input, shape index: {}]   ;;  %s3477_s6 = inlined_call_operand.vmem [shape: bf16[32,32], index: 6, kind: input, shape index: {}]   ;;  %s3478_s7 = inlined_call_operand.vmem [shape: f32[1,32], index: 7, kind: input, shape index: {}]   ;;  %s3479_s8 = inlined_call_operand.vmem [shape: f32[1,32], index: 8, kind: input, shape index: {}]   ;;  %s3480_s9 = inlined_call_operand.vmem [shape: f32[1,32], index: 9, kind: input, shape index: {}]   ;;  %s3481_s10 = inlined_call_operand.vmem [shape: f32[1,32], index: 10, kind: input, shape index: {}]   ;;  %s3482_s11 = inlined_call_operand.vmem [shape: bf16[32,8], index: 11, kind: input, shape index: {}]   ;;  %s3483_s12 = inlined_call_operand.vmem [shape: f32[1,8], index: 12, kind: input, shape index: {}]   ;;  %s3484_s13 = inlined_call_operand.vmem [shape: f32[1,8], index: 13, kind: input, shape index: {}]   ;;  %s3485_s14 = inlined_call_operand.vmem [shape: f32[1,8], index: 14, kind: input, shape index: {}]   ;;  %s3486_s15 = inlined_call_operand.vmem [shape: bf16[8,16], index: 15, kind: input, shape index: {}]   ;;  %s3487_s16 = inlined_call_operand.vmem [shape: f32[1,16], index: 16, kind: input, shape index: {}]   ;;  %s3488_s17 = inlined_call_operand.vmem [shape: bf16[16,8], index: 17, kind: input, shape index: {}]   ;;  %s3489_s18 = inlined_call_operand.vmem [shape: f32[1,8], index: 18, kind: input, shape index: {}]   ;;  %s3490_s19 = inlined_call_operand.vmem [shape: f32[1,8], index: 19, kind: input, shape index: {}]   ;;  %s3491_s20 = inlined_call_operand.vmem [shape: f32[1,8], index: 20, kind: input, shape index: {}]   ;;  %s3492_s21 = inlined_call_operand.hbm [shape: f32[2,8,8], index: 21, kind: output, shape index: {0}]   ;;  %s3493_s22 = inlined_call_operand.hbm [shape: f32[2,32], index: 22, kind: output, shape index: {1}]  }
   0x1   :  { %3498 = sst [smem:[#allocation9_spill]] %s3471_s0 }
   0x2   :  { %3499 = sst [smem:[#allocation10_spill]] %s3472_s1 }
   0x3   :  { %3500 = sst [smem:[#allocation11_spill]] %s3473_s2 }
   0x4   :  { %3501 = sst [smem:[#allocation12_spill]] %s3474_s3 }
   0x5   :  { %3502 = sst [smem:[#allocation13_spill]] %s3475_s4 }
   0x6   :  { %3503 = sst [smem:[#allocation14_spill]] %s3476_s5 }
   0x7   :  { %3504 = sst [smem:[#allocation15_spill]] %s3477_s6 }
   0x8   :  { %28 = vsyncpa [#allocation4], 0  ;;  %s3505_s29 = sld [smem:[#allocation10_spill]]  ;;  %vm88_vm0 = vcmask 1043456   ;;  %s3506_s0 = sld [smem:[#allocation11_spill]]  ;;  %v2830_v2 = vmov 0.0  }
   0x9   :  { %2359 = vmatprep.subr.bf16.mxu0 %v2830_v2  ;;  %2365 = vmatprep.subr.bf16.mxu1 %v2830_v2  ;;  %s3507_s5 = sld [smem:[#allocation9_spill]]  ;;  %vm84_vm1 = vcmask 64512   ;;  %s3508_s2 = sld [smem:[#allocation13_spill]]  ;;  %vm2831_vm2 = vmmov 0  }
   0xa   :  { %2361 = vmatprep.mubr.msk.bf16.mxu0 %vm2831_vm2, %v2830_v2  ;;  %2367 = vmatprep.mubr.msk.bf16.mxu1 %vm2831_vm2, %v2830_v2  ;;  %s3509_s28 = sld [smem:[#allocation12_spill]]  ;;  %s3510_s23 = sld [smem:[#allocation14_spill]] }
   0xe   :  { %v76_v0 = vld [vmem:[%s3505_s29] sm:$0xf] }
   0xf   :  { %v133_v1 = vld [vmem:[%s3506_s0] sm:$0xf]  ;;  %v90_v3 = vsel %vm88_vm0, %v76_v0, 0  ;;  %v74_v6 = vld [vmem:[%s3507_s5 + $0x8] sm:$0xff] }
  0x10   :  { %v142_v4 = vsel %vm88_vm0, %v133_v1, 0  ;;  %v73_v5 = vld [vmem:[%s3507_s5] sm:$0xff]  ;;  %2360 = vmatpush3.bf16.msra.mxu0 %v90_v3  ;;  %v2989_v11 = vld [vmem:[%s3508_s2 + $0x8] sm:$0xff]  }
  0x11   :  { %2366 = vmatpush3.bf16.msra.mxu1 %v142_v4  ;;  %v75_v7 = vpack.c.bf16 %v74_v6, %v73_v5  ;;  %v2971_v8 = vld [vmem:[%s3508_s2] sm:$0xff]   ;;  %2371 = vmatprep.subr.bf16.mxu0 %v2830_v2 }
  0x12   :  { %v185_v9 = vld [vmem:[%s3509_s28] sm:$0xf]  ;;  %2377 = vmatprep.subr.bf16.mxu1 %v2830_v2 }
  0x13   :  { %v194_v10 = vsel %vm88_vm0, %v185_v9, 0  ;;  %2362 = vmatmul.mubr.msk.bf16.vlgmr.msra.gmra.mrb[0].mxu0 %vm84_vm1, %v75_v7  ;;  %v3000_v12 = vld [vmem:[%s3510_s23] sm:$0xff]  }
  0x14   :  { %2368 = vmatmul.mubr.msk.bf16.vlgmr.msra.gmra.mrb[0].mxu1 %vm84_vm1, %v75_v7  ;;  %2372 = vmatpush3.bf16.msra.mxu0 %v194_v10 }
  0x15   :  { %2378 = vmatpush3.bf16.msra.mxu1 %v2971_v8  ;;  %2373 = vmatprep.mubr.msk.bf16.mxu0 %vm2831_vm2, %v2830_v2 }
  0x16   :  { %2379 = vmatprep.subr.bf16.mxu1 %v2830_v2  ;;  %2381 = vmatprep.mubr.msk.bf16.mxu1 %vm2831_vm2, %v2830_v2 }
  0x17   :  { %2385 = vmatprep.subr.bf16.mxu0 %v2830_v2 }
  0x19   :  { %2380 = vmatpush3.bf16.msra.mxu1 %v2989_v11 }
  0x1a   :  { %29 = vsyncpa [#allocation6], 0  ;;  %2393 = vmatprep.subr.bf16.mxu1 %v2830_v2  ;;  %s3511_s6 = sld [smem:[#allocation15_spill]]  ;;  %v2832_v14 = vmov 0   ;;  %v3014_v15 = vld [vmem:[%s3510_s23 + $0x8] sm:$0xff]   ;;  %vm470_vm3 = vcmask 253952  }
  0x1b   :  { %2374 = vmatmul.mubr.msk.bf16.vlgmr.msra.gmra.mrb[4].mxu0 %vm84_vm1, %v75_v7  ;;  %v2195_v22 = vld [vmem:[%s3478_s7] ss:$0 sm:$0xff]  ;;  %vm480_vm4 = vcmask 1041409   ;;  %vm262_vm5 = vcmask 261120   ;;  %vm666_vm6 = vcmask 254977   ;;  %vm864_vm7 = vcmask 256002  }
  0x1c   :  { %2382 = vmatmul.mubr.bf16.vlgmr.msra.gmra.mrb[4].mxu1 %v2832_v14  ;;  %2386 = vmatpush3.bf16.msra.mxu0 %v3000_v12  ;;  %v2197_v40 = vld [vmem:[%s3479_s8] ss:$0 sm:$0xff]  ;;  %vm1063_vm8 = vcmask 257027   ;;  %vm1262_vm9 = vcmask 258052   ;;  %vm1461_vm10 = vcmask 259077   ;;  %vm1660_vm11 = vcmask 260102  }
  0x1d   :  { %2389 = vmatprep.mubr.msk.bf16.mxu0 %vm2831_vm2, %v2830_v2  ;;  %2387 = vmatprep.subr.bf16.mxu0 %v2830_v2  ;;  %v3065_v61 = vld [vmem:[%s3481_s10] ss:$0 sm:$0xff]  ;;  %vm1859_vm12 = vcmask 261127   ;;  %vm2070_vm13 = vcmask 130048  }
  0x1e   :  { %2397 = vmatprep.mubr.msk.bf16.mxu1 %vm2831_vm2, %v2830_v2  ;;  %v2199_v3 = vld [vmem:[%s3480_s9] ss:$0 sm:$0xff] }
  0x20   :  { %v3007_v13 = vld [vmem:[%s3511_s6] sm:$0xff]   ;;  %v3023_v16 = vld [vmem:[%s3511_s6 + $0x8] sm:$0xff]   ;;  %2388 = vmatpush3.bf16.msra.mxu0 %v3014_v15 }
  0x21   :  { %2394 = vmatpush3.bf16.msra.mxu1 %v3007_v13  ;;  %2401 = vmatprep.subr.bf16.mxu0 %v2830_v2 }
  0x22   :  { %2395 = vmatprep.subr.bf16.mxu1 %v2830_v2 }
  0x23   :  { %2390 = vmatmul.mubr.bf16.vlgmr.msra.gmra.mrb[8].mxu0 %v2832_v14 }
  0x24   :  { %2402 = vmatpush3.bf16.msra.mxu0 %v2971_v8  ;;  %2405 = vmatprep.mubr.msk.bf16.mxu0 %vm2831_vm2, %v2830_v2 }
  0x25   :  { %2396 = vmatpush3.bf16.msra.mxu1 %v3023_v16  ;;  %2403 = vmatprep.subr.bf16.mxu0 %v2830_v2 }
  0x26   :  { %2409 = vmatprep.subr.bf16.mxu1 %v2830_v2 }
  0x28   :  { %2398 = vmatmul.mubr.bf16.vlgmr.msra.gmra.mrb[8].mxu1 %v2832_v14  ;;  %2404 = vmatpush3.bf16.msra.mxu0 %v2989_v11 }
  0x29   :  { %2410 = vmatpush3.bf16.msra.mxu1 %v3000_v12  ;;  %2413 = vmatprep.mubr.msk.bf16.mxu1 %vm2831_vm2, %v2830_v2 }
  0x2a   :  { %2411 = vmatprep.subr.bf16.mxu1 %v2830_v2  ;;  %2417 = vmatprep.subr.bf16.mxu0 %v2830_v2 }
  0x2d   :  { %2412 = vmatpush3.bf16.msra.mxu1 %v3014_v15 }
  0x2e   :  { %2425 = vmatprep.subr.bf16.mxu1 %v2830_v2 }
  0xe6   :  { %v126_v18 = vpop.f32.mrb[0].mxu0 }
  0xe7   :  { %v178_v17 = vpop.f32.mrb[0].mxu1  ;;  %v2363_v20 = vpop.f32.mrb[1].mxu0  ;;  %v3047_v26 = vadd.f32 %v2195_v22, %v126_v18 }
  0xe8   :  { %v2369_v19 = vpop.f32.mrb[1].mxu1  ;;  %v129_v23 = vpop.f32.mrb[2].mxu0  ;;  %v3056_v42 = vadd.f32 %v2197_v40, %v178_v17 }
  0xe9   :  { %v181_v21 = vpop.f32.mrb[2].mxu1  ;;  %v2364_v25 = vpop.f32.mrb[3].mxu0  ;;  %v3049_v29 = vadd.f32 %v2195_v22, %v129_v23 }
  0xea   :  { %v2370_v24 = vpop.f32.mrb[3].mxu1  ;;  %v3058_v44 = vadd.f32 %v2197_v40, %v181_v21 }
  0xee   :  { %v230_v28 = vpop.f32.mrb[4].mxu0 }
  0xef   :  { %v300_v27 = vpop.f32.mrb[4].mxu1  ;;  %v2375_v33 = vpop.f32.mrb[5].mxu0  ;;  %v3071_v7 = vadd.f32 %v2199_v3, %v230_v28 }
  0xf0   :  { %v359_v30 = vrot.slane %v300_v27, 1  ;;  %v362_v31 = vadd.f32 %v300_v27, %v3047_v26  ;;  %v2383_v32 = vpop.f32.mrb[5].mxu1  ;;  %v233_v35 = vpop.f32.mrb[6].mxu0 }
  0xf1   :  { %v303_v34 = vpop.f32.mrb[6].mxu1  ;;  %v2376_v39 = vpop.f32.mrb[7].mxu0  ;;  %v3073_v14 = vadd.f32 %v2199_v3, %v233_v35 }
  0xf2   :  { %v363_v36 = vadd.f32 %v359_v30, %v3049_v29  ;;  %v2205_v37 = vmul.f32 -1.442695, %v362_v31  ;;  %v2384_v38 = vpop.f32.mrb[7].mxu1 }
  0xf4   :  { %2605 = vpow2.f32 %v2205_v37  ;;  %v2206_v41 = vmul.f32 -1.442695, %v363_v36 }
  0xf6   :  { %2607 = vpow2.f32 %v2206_v41  ;;  %v352_v43 = vpop.f32.mrb[8].mxu0 }
  0xf7   :  { %v377_v45 = vrot.slane %v352_v43, 1  ;;  %v380_v46 = vadd.f32 %v352_v43, %v3056_v42  ;;  %v2391_v47 = vpop.f32.mrb[9].mxu0 }
  0xf8   :  { %v355_v49 = vpop.f32.mrb[10].mxu0 }
  0xf9   :  { %v381_v51 = vadd.f32 %v377_v45, %v3058_v44  ;;  %v2207_v52 = vmul.f32 -1.442695, %v380_v46  ;;  %v2392_v53 = vpop.f32.mrb[11].mxu0 }
  0xfb   :  { %v446_v48 = vpop.f32.mrb[8].mxu1  ;;  %2609 = vpow2.f32 %v2207_v52  ;;  %v2208_v56 = vmul.f32 -1.442695, %v381_v51 }
  0xfc   :  { %v2399_v50 = vpop.f32.mrb[9].mxu1  ;;  %v447_v63 = vadd.f32 %v3065_v61, %v446_v48 }
  0xfd   :  { %v449_v54 = vpop.f32.mrb[10].mxu1  ;;  %2611 = vpow2.f32 %v2208_v56 }
  0xfe   :  { %v2400_v55 = vpop.f32.mrb[11].mxu1  ;;  %v2606_v57 = vpop.eup %2605  ;;  %v453_v5 = vrot.slane %v447_v63, 1 }
  0xff   :  { %v370_v58 = vadd.f32 1.0, %v2606_v57 }
 0x100   :  { %v2608_v59 = vpop.eup %2607 }
 0x101   :  { %v371_v60 = vadd.f32 1.0, %v2608_v59  ;;  %2613 = vrcp.f32 %v370_v58 }
 0x103   :  { %2615 = vrcp.f32 %v371_v60 }
 0x105   :  { %v2610_v62 = vpop.eup %2609 }
 0x106   :  { %v388_v1 = vadd.f32 1.0, %v2610_v62 }
 0x107   :  { %v2612_v0 = vpop.eup %2611 }
 0x108   :  { %v389_v4 = vadd.f32 1.0, %v2612_v0  ;;  %2617 = vrcp.f32 %v388_v1 }
 0x10a   :  { %2619 = vrcp.f32 %v389_v4 }
 0x10b   :  { %v2614_v6 = vpop.eup %2613 }
 0x10c   :  { %v456_v9 = vmul.f32 %v2614_v6, %v447_v63 }
 0x10d   :  { %v2616_v10 = vpop.eup %2615 }
 0x10e   :  { %v457_v17 = vmul.f32 %v2616_v10, %v453_v5  ;;  %v458_v18 = vadd.f32 %v456_v9, %v3071_v7 }
 0x110   :  { %v459_v19 = vadd.f32 %v457_v17, %v3073_v14  ;;  %2621 = vtanh.f32 %v458_v18 }
 0x112   :  { %2623 = vtanh.f32 %v459_v19  ;;  %v2618_v20 = vpop.eup %2617 }
 0x113   :  { %v462_v22 = vsub.f32 1.0, %v2618_v20  ;;  %v466_v25 = vmul.f32 0.0, %v2618_v20 }
 0x114   :  { %v2620_v21 = vpop.eup %2619 }
 0x115   :  { %v463_v24 = vsub.f32 1.0, %v2620_v21  ;;  %v467_v30 = vmul.f32 0.0, %v2620_v21 }
 0x11a   :  { %v2622_v23 = vpop.eup %2621 }
 0x11b   :  { %v464_v27 = vmul.f32 %v2622_v23, %v462_v22 }
 0x11c   :  { %v2624_v28 = vpop.eup %2623 }
 0x11d   :  { %v465_v31 = vmul.f32 %v2624_v28, %v463_v24  ;;  %v3077_v32 = vadd.f32 %v466_v25, %v464_v27 }
 0x11f   :  { %v3079_v33 = vadd.f32 %v467_v30, %v465_v31  ;;  %471 = vst.msk [vmem:[#allocation2] sm:$0x1] %vm470_vm3, %v3077_v32  ;;  %v473_v34 = vpack.c.bf16 %v3077_v32, %v3077_v32  ;;  %v658_v27 = vrot.slane %v3077_v32, 7 }
 0x121   :  { %472 = vst.msk [vmem:[#allocation2 + $0x8] sm:$0x1] %vm470_vm3, %v3079_v33  ;;  %v474_v35 = vpack.c.bf16 %v3079_v33, %v3079_v33  ;;  %v477_v37 = vunpack.c.l.b16 %v473_v34  ;;  %v659_v21 = vrot.slane %v3079_v33, 7 }
 0x123   :  { %v478_v36 = vunpack.c.l.b16 %v474_v35 }
 0x125   :  { %v479_v38 = vrot.slane %v478_v36, 7 }
 0x127   :  { %v481_v39 = vsel %vm480_vm4, %v479_v38, %v477_v37 }
 0x128   :  { %v482_v40 = vpack.c.b16 %v481_v39, %v481_v39 }
 0x12a   :  { %2406 = vmatmul.mubr.msk.bf16.vlgmr.msra.gmra.mrb[12].mxu0 %vm262_vm5, %v482_v40  ;;  %2414 = vmatmul.mubr.msk.bf16.vlgmr.msra.gmra.mrb[12].mxu1 %vm262_vm5, %v482_v40 }
 0x12b   :  { %2418 = vmatpush3.bf16.msra.mxu0 %v3007_v13  ;;  %2421 = vmatprep.mubr.msk.bf16.mxu0 %vm2831_vm2, %v2830_v2 }
 0x12c   :  { %2419 = vmatprep.subr.bf16.mxu0 %v2830_v2  ;;  %2426 = vmatpush3.bf16.msra.mxu1 %v2971_v8 }
 0x12d   :  { %2427 = vmatprep.subr.bf16.mxu1 %v2830_v2  ;;  %2429 = vmatprep.mubr.msk.bf16.mxu1 %vm2831_vm2, %v2830_v2 }
 0x12f   :  { %2420 = vmatpush3.bf16.msra.mxu0 %v3023_v16 }
 0x130   :  { %2433 = vmatprep.subr.bf16.mxu0 %v2830_v2  ;;  %2428 = vmatpush3.bf16.msra.mxu1 %v2989_v11 }
 0x131   :  { %2441 = vmatprep.subr.bf16.mxu1 %v2830_v2 }
 0x132   :  { %2422 = vmatmul.mubr.msk.bf16.vlgmr.msra.gmra.mrb[16].mxu0 %vm262_vm5, %v482_v40 }
 0x133   :  { %2434 = vmatpush3.bf16.msra.mxu0 %v3000_v12  ;;  %2437 = vmatprep.mubr.msk.bf16.mxu0 %vm2831_vm2, %v2830_v2 }
 0x134   :  { %2435 = vmatprep.subr.bf16.mxu0 %v2830_v2 }
 0x137   :  { %2436 = vmatpush3.bf16.msra.mxu0 %v3014_v15 }
 0x138   :  { %2449 = vmatprep.subr.bf16.mxu0 %v2830_v2 }
 0x1fd   :  { %v520_v41 = vpop.f32.mrb[12].mxu0  ;;  %v560_v43 = vpop.f32.mrb[12].mxu1 }
 0x1fe   :  { %v567_v45 = vrot.slane %v520_v41, 7  ;;  %v571_v46 = vadd.f32 %v520_v41, %v3049_v29  ;;  %v585_v47 = vrot.slane %v560_v43, 7  ;;  %v589_v48 = vadd.f32 %v560_v43, %v3058_v44  ;;  %v2407_v49 = vpop.f32.mrb[13].mxu0  ;;  %v2415_v50 = vpop.f32.mrb[13].mxu1 }
 0x1ff   :  { %v523_v51 = vpop.f32.mrb[14].mxu0  ;;  %v563_v52 = vpop.f32.mrb[14].mxu1 }
 0x200   :  { %v570_v53 = vadd.f32 %v567_v45, %v3047_v26  ;;  %v2215_v54 = vmul.f32 -1.442695, %v571_v46  ;;  %v588_v55 = vadd.f32 %v585_v47, %v3056_v42  ;;  %v2217_v56 = vmul.f32 -1.442695, %v589_v48  ;;  %v2408_v57 = vpop.f32.mrb[15].mxu0  ;;  %v2416_v58 = vpop.f32.mrb[15].mxu1 }
 0x202   :  { %v2214_v59 = vmul.f32 -1.442695, %v570_v53  ;;  %2625 = vpow2.f32 %v2215_v54  ;;  %v2216_v60 = vmul.f32 -1.442695, %v588_v55 }
 0x203   :  { %2627 = vpow2.f32 %v2217_v56 }
 0x204   :  { %2629 = vpow2.f32 %v2214_v59 }
 0x205   :  { %2631 = vpow2.f32 %v2216_v60  ;;  %v636_v62 = vpop.f32.mrb[16].mxu0 }
 0x206   :  { %v2423_v63 = vpop.f32.mrb[17].mxu0  ;;  %v637_v19 = vadd.f32 %v3065_v61, %v636_v62 }
 0x207   :  { %v639_v0 = vpop.f32.mrb[18].mxu0 }
 0x208   :  { %v2424_v1 = vpop.f32.mrb[19].mxu0  ;;  %v643_v23 = vrot.slane %v637_v19, 7 }
 0x20c   :  { %v2626_v3 = vpop.eup %2625 }
 0x20d   :  { %v2628_v4 = vpop.eup %2627  ;;  %v579_v5 = vadd.f32 1.0, %v2626_v3 }
 0x20e   :  { %v2630_v6 = vpop.eup %2629  ;;  %v597_v9 = vadd.f32 1.0, %v2628_v4 }
 0x20f   :  { %v2632_v10 = vpop.eup %2631  ;;  %v578_v17 = vadd.f32 1.0, %v2630_v6  ;;  %2633 = vrcp.f32 %v579_v5 }
 0x210   :  { %v596_v18 = vadd.f32 1.0, %v2632_v10  ;;  %2635 = vrcp.f32 %v597_v9 }
 0x211   :  { %2637 = vrcp.f32 %v578_v17 }
 0x212   :  { %2639 = vrcp.f32 %v596_v18 }
 0x219   :  { %v2634_v20 = vpop.eup %2633 }
 0x21a   :  { %v2636_v22 = vpop.eup %2635  ;;  %v647_v24 = vmul.f32 %v2634_v20, %v637_v19 }
 0x21b   :  { %v2638_v25 = vpop.eup %2637  ;;  %v663_v28 = vmul.f32 %v2636_v22, %v659_v21  ;;  %v653_v37 = vsub.f32 1.0, %v2636_v22 }
 0x21c   :  { %v2640_v30 = vpop.eup %2639  ;;  %v646_v31 = vmul.f32 %v2638_v25, %v643_v23  ;;  %v649_v34 = vadd.f32 %v647_v24, %v3073_v14 }
 0x21d   :  { %v662_v35 = vmul.f32 %v2640_v30, %v658_v27  ;;  %v652_v39 = vsub.f32 1.0, %v2640_v30 }
 0x21e   :  { %v648_v36 = vadd.f32 %v646_v31, %v3071_v7  ;;  %2641 = vtanh.f32 %v649_v34 }
 0x220   :  { %2643 = vtanh.f32 %v648_v36 }
 0x228   :  { %v2642_v38 = vpop.eup %2641 }
 0x229   :  { %v655_v33 = vmul.f32 %v2642_v38, %v653_v37 }
 0x22a   :  { %v2644_v40 = vpop.eup %2643 }
 0x22b   :  { %v654_v41 = vmul.f32 %v2644_v40, %v652_v39  ;;  %v3120_v43 = vadd.f32 %v663_v28, %v655_v33 }
 0x22d   :  { %v3122_v32 = vadd.f32 %v662_v35, %v654_v41  ;;  %668 = vst.msk [vmem:[#allocation2 + $0x8] sm:$0x2] %vm666_vm6, %v3120_v43  ;;  %v670_v46 = vpack.c.bf16 %v3120_v43, %v3120_v43  ;;  %v857_v41 = vrot.slane %v3120_v43, 7 }
 0x22f   :  { %667 = vst.msk [vmem:[#allocation2] sm:$0x2] %vm666_vm6, %v3122_v32  ;;  %v669_v45 = vpack.c.bf16 %v3122_v32, %v3122_v32  ;;  %v674_v48 = vunpack.c.l.b16 %v670_v46  ;;  %v856_v39 = vrot.slane %v3122_v32, 7 }
 0x231   :  { %v673_v47 = vunpack.c.l.b16 %v669_v45 }
 0x233   :  { %v675_v49 = vrot.slane %v673_v47, 1 }
 0x235   :  { %v676_v50 = vsel %vm480_vm4, %v674_v48, %v675_v49 }
 0x236   :  { %v677_v51 = vpack.c.b16 %v676_v50, %v676_v50 }
 0x238   :  { %2430 = vmatmul.mubr.msk.bf16.vlgmr.msra.gmra.mrb[16].mxu1 %vm262_vm5, %v677_v51  ;;  %2438 = vmatmul.mubr.msk.bf16.vlgmr.msra.gmra.mrb[20].mxu0 %vm262_vm5, %v677_v51 }
 0x239   :  { %2442 = vmatpush3.bf16.msra.mxu1 %v3007_v13  ;;  %2445 = vmatprep.mubr.msk.bf16.mxu1 %vm2831_vm2, %v2830_v2 }
 0x23a   :  { %2443 = vmatprep.subr.bf16.mxu1 %v2830_v2  ;;  %2450 = vmatpush3.bf16.msra.mxu0 %v2971_v8 }
 0x23b   :  { %2451 = vmatprep.subr.bf16.mxu0 %v2830_v2  ;;  %2453 = vmatprep.mubr.msk.bf16.mxu0 %vm2831_vm2, %v2830_v2 }
 0x23d   :  { %2444 = vmatpush3.bf16.msra.mxu1 %v3023_v16 }
 0x23e   :  { %2457 = vmatprep.subr.bf16.mxu1 %v2830_v2  ;;  %2452 = vmatpush3.bf16.msra.mxu0 %v2989_v11 }
 0x23f   :  { %2465 = vmatprep.subr.bf16.mxu0 %v2830_v2 }
 0x240   :  { %2446 = vmatmul.mubr.msk.bf16.vlgmr.msra.gmra.mrb[20].mxu1 %vm262_vm5, %v677_v51 }
 0x241   :  { %2458 = vmatpush3.bf16.msra.mxu1 %v3000_v12  ;;  %2461 = vmatprep.mubr.msk.bf16.mxu1 %vm2831_vm2, %v2830_v2 }
 0x242   :  { %2459 = vmatprep.subr.bf16.mxu1 %v2830_v2 }
 0x245   :  { %2460 = vmatpush3.bf16.msra.mxu1 %v3014_v15 }
 0x246   :  { %2473 = vmatprep.subr.bf16.mxu1 %v2830_v2 }
 0x30b   :  { %v715_v52 = vpop.f32.mrb[16].mxu1  ;;  %v755_v53 = vpop.f32.mrb[20].mxu0 }
 0x30c   :  { %v762_v54 = vrot.slane %v715_v52, 6  ;;  %v763_v55 = vrot.slane %v715_v52, 7  ;;  %v781_v56 = vrot.slane %v755_v53, 6  ;;  %v782_v57 = vrot.slane %v755_v53, 7  ;;  %v2431_v58 = vpop.f32.mrb[17].mxu1  ;;  %v2439_v59 = vpop.f32.mrb[21].mxu0 }
 0x30d   :  { %v718_v60 = vpop.f32.mrb[18].mxu1  ;;  %v758_v62 = vpop.f32.mrb[22].mxu0 }
 0x30e   :  { %v766_v63 = vadd.f32 %v762_v54, %v3047_v26  ;;  %v767_v0 = vadd.f32 %v763_v55, %v3049_v29  ;;  %v785_v1 = vadd.f32 %v781_v56, %v3056_v42  ;;  %v786_v3 = vadd.f32 %v782_v57, %v3058_v44  ;;  %v2432_v4 = vpop.f32.mrb[19].mxu1  ;;  %v2440_v5 = vpop.f32.mrb[23].mxu0 }
 0x310   :  { %v2221_v6 = vmul.f32 -1.442695, %v766_v63  ;;  %v2222_v9 = vmul.f32 -1.442695, %v767_v0  ;;  %v2223_v10 = vmul.f32 -1.442695, %v785_v1 }
 0x311   :  { %v2224_v17 = vmul.f32 -1.442695, %v786_v3 }
 0x312   :  { %2645 = vpow2.f32 %v2221_v6 }
 0x313   :  { %2647 = vpow2.f32 %v2222_v9  ;;  %v833_v18 = vpop.f32.mrb[20].mxu1 }
 0x314   :  { %2649 = vpow2.f32 %v2223_v10  ;;  %v2447_v19 = vpop.f32.mrb[21].mxu1  ;;  %v834_v34 = vadd.f32 %v3065_v61, %v833_v18 }
 0x315   :  { %2651 = vpow2.f32 %v2224_v17  ;;  %v836_v20 = vpop.f32.mrb[22].mxu1 }
 0x316   :  { %v2448_v21 = vpop.f32.mrb[23].mxu1  ;;  %v840_v35 = vrot.slane %v834_v34, 6  ;;  %v841_v37 = vrot.slane %v834_v34, 7 }
 0x31c   :  { %v2646_v22 = vpop.eup %2645 }
 0x31d   :  { %v2648_v23 = vpop.eup %2647  ;;  %v774_v24 = vadd.f32 1.0, %v2646_v22 }
 0x31e   :  { %v2650_v25 = vpop.eup %2649  ;;  %v775_v27 = vadd.f32 1.0, %v2648_v23 }
 0x31f   :  { %v2652_v28 = vpop.eup %2651  ;;  %2653 = vrcp.f32 %v774_v24  ;;  %v793_v30 = vadd.f32 1.0, %v2650_v25 }
 0x320   :  { %2655 = vrcp.f32 %v775_v27  ;;  %v794_v31 = vadd.f32 1.0, %v2652_v28 }
 0x321   :  { %2657 = vrcp.f32 %v793_v30 }
 0x322   :  { %2659 = vrcp.f32 %v794_v31 }
 0x329   :  { %v2654_v36 = vpop.eup %2653 }
 0x32a   :  { %v2656_v38 = vpop.eup %2655  ;;  %v844_v33 = vmul.f32 %v2654_v36, %v840_v35 }
 0x32b   :  { %v2658_v40 = vpop.eup %2657  ;;  %v845_v45 = vmul.f32 %v2656_v38, %v841_v37 }
 0x32c   :  { %v2660_v46 = vpop.eup %2659  ;;  %v860_v47 = vmul.f32 %v2658_v40, %v856_v39  ;;  %v846_v48 = vadd.f32 %v844_v33, %v3071_v7  ;;  %v850_v51 = vsub.f32 1.0, %v2658_v40 }
 0x32d   :  { %v861_v49 = vmul.f32 %v2660_v46, %v857_v41  ;;  %v847_v50 = vadd.f32 %v845_v45, %v3073_v14  ;;  %v851_v53 = vsub.f32 1.0, %v2660_v46 }
 0x32e   :  { %2661 = vtanh.f32 %v846_v48 }
 0x32f   :  { %2663 = vtanh.f32 %v847_v50 }
 0x338   :  { %v2662_v52 = vpop.eup %2661 }
 0x339   :  { %v2664_v54 = vpop.eup %2663  ;;  %v852_v55 = vmul.f32 %v2662_v52, %v850_v51 }
 0x33a   :  { %v853_v32 = vmul.f32 %v2664_v54, %v851_v53 }
 0x33b   :  { %v3161_v56 = vadd.f32 %v860_v47, %v852_v55 }
 0x33c   :  { %v3163_v43 = vadd.f32 %v861_v49, %v853_v32 }
 0x33d   :  { %865 = vst.msk [vmem:[#allocation2] sm:$0x4] %vm864_vm7, %v3161_v56  ;;  %v867_v57 = vpack.c.bf16 %v3161_v56, %v3161_v56  ;;  %v1055_v54 = vrot.slane %v3161_v56, 7 }
 0x33e   :  { %866 = vst.msk [vmem:[#allocation2 + $0x8] sm:$0x4] %vm864_vm7, %v3163_v43  ;;  %v868_v58 = vpack.c.bf16 %v3163_v43, %v3163_v43 }
 0x33f   :  { %v871_v59 = vunpack.c.l.b16 %v867_v57  ;;  %v1056_v57 = vrot.slane %v3163_v43, 7 }
 0x340   :  { %v872_v60 = vunpack.c.l.b16 %v868_v58 }
 0x341   :  { %v873_v62 = vrot.slane %v871_v59, 2 }
 0x342   :  { %v874_v63 = vrot.slane %v872_v60, 1 }
 0x344   :  { %v875_v0 = vsel %vm480_vm4, %v874_v63, %v873_v62 }
 0x345   :  { %v876_v1 = vpack.c.b16 %v875_v0, %v875_v0 }
 0x347   :  { %2454 = vmatmul.mubr.msk.bf16.vlgmr.msra.gmra.mrb[24].mxu0 %vm262_vm5, %v876_v1  ;;  %2462 = vmatmul.mubr.msk.bf16.vlgmr.msra.gmra.mrb[24].mxu1 %vm262_vm5, %v876_v1 }
 0x348   :  { %2466 = vmatpush3.bf16.msra.mxu0 %v3007_v13  ;;  %2469 = vmatprep.mubr.msk.bf16.mxu0 %vm2831_vm2, %v2830_v2 }
 0x349   :  { %2467 = vmatprep.subr.bf16.mxu0 %v2830_v2  ;;  %2474 = vmatpush3.bf16.msra.mxu1 %v2971_v8 }
 0x34a   :  { %2475 = vmatprep.subr.bf16.mxu1 %v2830_v2  ;;  %2477 = vmatprep.mubr.msk.bf16.mxu1 %vm2831_vm2, %v2830_v2 }
 0x34c   :  { %2468 = vmatpush3.bf16.msra.mxu0 %v3023_v16 }
 0x34d   :  { %2481 = vmatprep.subr.bf16.mxu0 %v2830_v2  ;;  %2476 = vmatpush3.bf16.msra.mxu1 %v2989_v11 }
 0x34e   :  { %2489 = vmatprep.subr.bf16.mxu1 %v2830_v2 }
 0x34f   :  { %2470 = vmatmul.mubr.msk.bf16.vlgmr.msra.gmra.mrb[28].mxu0 %vm262_vm5, %v876_v1 }
 0x350   :  { %2482 = vmatpush3.bf16.msra.mxu0 %v3000_v12  ;;  %2485 = vmatprep.mubr.msk.bf16.mxu0 %vm2831_vm2, %v2830_v2 }
 0x351   :  { %2483 = vmatprep.subr.bf16.mxu0 %v2830_v2 }
 0x354   :  { %2484 = vmatpush3.bf16.msra.mxu0 %v3014_v15 }
 0x355   :  { %2497 = vmatprep.subr.bf16.mxu0 %v2830_v2 }
 0x41a   :  { %v914_v3 = vpop.f32.mrb[24].mxu0  ;;  %v954_v4 = vpop.f32.mrb[24].mxu1 }
 0x41b   :  { %v961_v5 = vrot.slane %v914_v3, 5  ;;  %v962_v6 = vrot.slane %v914_v3, 6  ;;  %v980_v9 = vrot.slane %v954_v4, 5  ;;  %v981_v10 = vrot.slane %v954_v4, 6  ;;  %v2455_v17 = vpop.f32.mrb[25].mxu0  ;;  %v2463_v18 = vpop.f32.mrb[25].mxu1 }
 0x41c   :  { %v917_v19 = vpop.f32.mrb[26].mxu0  ;;  %v957_v20 = vpop.f32.mrb[26].mxu1 }
 0x41d   :  { %v965_v21 = vadd.f32 %v961_v5, %v3047_v26  ;;  %v966_v22 = vadd.f32 %v962_v6, %v3049_v29  ;;  %v984_v23 = vadd.f32 %v980_v9, %v3056_v42  ;;  %v985_v24 = vadd.f32 %v981_v10, %v3058_v44  ;;  %v2456_v25 = vpop.f32.mrb[27].mxu0  ;;  %v2464_v27 = vpop.f32.mrb[27].mxu1 }
 0x41f   :  { %v2228_v28 = vmul.f32 -1.442695, %v965_v21  ;;  %v2229_v30 = vmul.f32 -1.442695, %v966_v22  ;;  %v2230_v31 = vmul.f32 -1.442695, %v984_v23 }
 0x420   :  { %v2231_v34 = vmul.f32 -1.442695, %v985_v24 }
 0x421   :  { %2665 = vpow2.f32 %v2228_v28 }
 0x422   :  { %2667 = vpow2.f32 %v2229_v30  ;;  %v1032_v35 = vpop.f32.mrb[28].mxu0 }
 0x423   :  { %2669 = vpow2.f32 %v2230_v31  ;;  %v2471_v36 = vpop.f32.mrb[29].mxu0  ;;  %v1033_v49 = vadd.f32 %v3065_v61, %v1032_v35 }
 0x424   :  { %2671 = vpow2.f32 %v2231_v34  ;;  %v1035_v37 = vpop.f32.mrb[30].mxu0 }
 0x425   :  { %v2472_v38 = vpop.f32.mrb[31].mxu0  ;;  %v1039_v50 = vrot.slane %v1033_v49, 5  ;;  %v1040_v52 = vrot.slane %v1033_v49, 6 }
 0x42b   :  { %v2666_v39 = vpop.eup %2665 }
 0x42c   :  { %v2668_v33 = vpop.eup %2667  ;;  %v973_v40 = vadd.f32 1.0, %v2666_v39 }
 0x42d   :  { %v2670_v41 = vpop.eup %2669  ;;  %v974_v45 = vadd.f32 1.0, %v2668_v33 }
 0x42e   :  { %v2672_v46 = vpop.eup %2671  ;;  %2673 = vrcp.f32 %v973_v40  ;;  %v992_v47 = vadd.f32 1.0, %v2670_v41 }
 0x42f   :  { %2675 = vrcp.f32 %v974_v45  ;;  %v993_v48 = vadd.f32 1.0, %v2672_v46 }
 0x430   :  { %2677 = vrcp.f32 %v992_v47 }
 0x431   :  { %2679 = vrcp.f32 %v993_v48 }
 0x438   :  { %v2674_v51 = vpop.eup %2673 }
 0x439   :  { %v2676_v53 = vpop.eup %2675  ;;  %v1043_v55 = vmul.f32 %v2674_v51, %v1039_v50 }
 0x43a   :  { %v2678_v32 = vpop.eup %2677  ;;  %v1044_v58 = vmul.f32 %v2676_v53, %v1040_v52 }
 0x43b   :  { %v2680_v59 = vpop.eup %2679  ;;  %v1059_v60 = vmul.f32 %v2678_v32, %v1055_v54  ;;  %v1045_v62 = vadd.f32 %v1043_v55, %v3071_v7  ;;  %v1049_v1 = vsub.f32 1.0, %v2678_v32 }
 0x43c   :  { %v1060_v63 = vmul.f32 %v2680_v59, %v1056_v57  ;;  %v1046_v0 = vadd.f32 %v1044_v58, %v3073_v14  ;;  %v1050_v4 = vsub.f32 1.0, %v2680_v59 }
 0x43d   :  { %2681 = vtanh.f32 %v1045_v62 }
 0x43e   :  { %2683 = vtanh.f32 %v1046_v0 }
 0x447   :  { %v2682_v3 = vpop.eup %2681 }
 0x448   :  { %v2684_v5 = vpop.eup %2683  ;;  %v1051_v6 = vmul.f32 %v2682_v3, %v1049_v1 }
 0x449   :  { %v1052_v56 = vmul.f32 %v2684_v5, %v1050_v4 }
 0x44a   :  { %v3202_v9 = vadd.f32 %v1059_v60, %v1051_v6 }
 0x44b   :  { %v3204_v43 = vadd.f32 %v1060_v63, %v1052_v56 }
 0x44c   :  { %1064 = vst.msk [vmem:[#allocation2] sm:$0x8] %vm1063_vm8, %v3202_v9  ;;  %v1066_v10 = vpack.c.bf16 %v3202_v9, %v3202_v9  ;;  %v1254_v1 = vrot.slane %v3202_v9, 7 }
 0x44d   :  { %1065 = vst.msk [vmem:[#allocation2 + $0x8] sm:$0x8] %vm1063_vm8, %v3204_v43  ;;  %v1067_v17 = vpack.c.bf16 %v3204_v43, %v3204_v43  ;;  %v1255_v5 = vrot.slane %v3204_v43, 7 }
 0x44e   :  { %v1070_v18 = vunpack.c.l.b16 %v1066_v10 }
 0x44f   :  { %v1071_v19 = vunpack.c.l.b16 %v1067_v17 }
 0x450   :  { %v1072_v20 = vrot.slane %v1070_v18, 3 }
 0x451   :  { %v1073_v21 = vrot.slane %v1071_v19, 2 }
 0x453   :  { %v1074_v22 = vsel %vm480_vm4, %v1073_v21, %v1072_v20 }
 0x454   :  { %v1075_v23 = vpack.c.b16 %v1074_v22, %v1074_v22 }
 0x456   :  { %2478 = vmatmul.mubr.msk.bf16.vlgmr.msra.gmra.mrb[28].mxu1 %vm262_vm5, %v1075_v23  ;;  %2486 = vmatmul.mubr.msk.bf16.vlgmr.msra.gmra.mrb[32].mxu0 %vm262_vm5, %v1075_v23 }
 0x457   :  { %2490 = vmatpush3.bf16.msra.mxu1 %v3007_v13  ;;  %2493 = vmatprep.mubr.msk.bf16.mxu1 %vm2831_vm2, %v2830_v2 }
 0x458   :  { %2491 = vmatprep.subr.bf16.mxu1 %v2830_v2  ;;  %2498 = vmatpush3.bf16.msra.mxu0 %v2971_v8 }
 0x459   :  { %2499 = vmatprep.subr.bf16.mxu0 %v2830_v2  ;;  %2501 = vmatprep.mubr.msk.bf16.mxu0 %vm2831_vm2, %v2830_v2 }
 0x45b   :  { %2492 = vmatpush3.bf16.msra.mxu1 %v3023_v16 }
 0x45c   :  { %2505 = vmatprep.subr.bf16.mxu1 %v2830_v2  ;;  %2500 = vmatpush3.bf16.msra.mxu0 %v2989_v11 }
 0x45d   :  { %2513 = vmatprep.subr.bf16.mxu0 %v2830_v2 }
 0x45e   :  { %2494 = vmatmul.mubr.msk.bf16.vlgmr.msra.gmra.mrb[32].mxu1 %vm262_vm5, %v1075_v23 }
 0x45f   :  { %2506 = vmatpush3.bf16.msra.mxu1 %v3000_v12  ;;  %2509 = vmatprep.mubr.msk.bf16.mxu1 %vm2831_vm2, %v2830_v2 }
 0x460   :  { %2507 = vmatprep.subr.bf16.mxu1 %v2830_v2 }
 0x463   :  { %2508 = vmatpush3.bf16.msra.mxu1 %v3014_v15 }
 0x464   :  { %2521 = vmatprep.subr.bf16.mxu1 %v2830_v2 }
 0x529   :  { %v1113_v8 = vpop.f32.mrb[28].mxu1  ;;  %v1153_v24 = vpop.f32.mrb[32].mxu0 }
 0x52a   :  { %v1160_v25 = vrot.slane %v1113_v8, 4  ;;  %v1161_v27 = vrot.slane %v1113_v8, 5  ;;  %v1179_v11 = vrot.slane %v1153_v24, 4  ;;  %v1180_v28 = vrot.slane %v1153_v24, 5  ;;  %v2479_v30 = vpop.f32.mrb[29].mxu1  ;;  %v2487_v31 = vpop.f32.mrb[33].mxu0 }
 0x52b   :  { %v1116_v34 = vpop.f32.mrb[30].mxu1  ;;  %v1156_v35 = vpop.f32.mrb[34].mxu0 }
 0x52c   :  { %v1164_v12 = vadd.f32 %v1160_v25, %v3047_v26  ;;  %v1165_v36 = vadd.f32 %v1161_v27, %v3049_v29  ;;  %v1183_v37 = vadd.f32 %v1179_v11, %v3056_v42  ;;  %v1184_v38 = vadd.f32 %v1180_v28, %v3058_v44  ;;  %v2480_v39 = vpop.f32.mrb[31].mxu1  ;;  %v2488_v33 = vpop.f32.mrb[35].mxu0 }
 0x52e   :  { %v2235_v40 = vmul.f32 -1.442695, %v1164_v12  ;;  %v2236_v41 = vmul.f32 -1.442695, %v1165_v36  ;;  %v2237_v45 = vmul.f32 -1.442695, %v1183_v37 }
 0x52f   :  { %v2238_v46 = vmul.f32 -1.442695, %v1184_v38  ;;  %v3263_v12 = vld [vmem:[%s3508_s2] sm:$0xff]  }
 0x530   :  { %2685 = vpow2.f32 %v2235_v40  ;;  %v3282_v36 = vld [vmem:[%s3510_s23] sm:$0xff]  }
 0x531   :  { %2687 = vpow2.f32 %v2236_v41  ;;  %v1231_v47 = vpop.f32.mrb[32].mxu1 }
 0x532   :  { %2689 = vpow2.f32 %v2237_v45  ;;  %v2495_v48 = vpop.f32.mrb[33].mxu1  ;;  %v1232_v59 = vadd.f32 %v3065_v61, %v1231_v47 }
 0x533   :  { %2691 = vpow2.f32 %v2238_v46  ;;  %v1234_v49 = vpop.f32.mrb[34].mxu1 }
 0x534   :  { %v2496_v50 = vpop.f32.mrb[35].mxu1  ;;  %v1238_v60 = vrot.slane %v1232_v59, 4  ;;  %v1239_v63 = vrot.slane %v1232_v59, 5 }
 0x53a   :  { %v2686_v51 = vpop.eup %2685 }
 0x53b   :  { %v2688_v52 = vpop.eup %2687  ;;  %v1172_v53 = vadd.f32 1.0, %v2686_v51 }
 0x53c   :  { %v2690_v54 = vpop.eup %2689  ;;  %v1173_v55 = vadd.f32 1.0, %v2688_v52 }
 0x53d   :  { %v2692_v32 = vpop.eup %2691  ;;  %2693 = vrcp.f32 %v1172_v53  ;;  %v1191_v57 = vadd.f32 1.0, %v2690_v54 }
 0x53e   :  { %2695 = vrcp.f32 %v1173_v55  ;;  %v1192_v58 = vadd.f32 1.0, %v2692_v32 }
 0x53f   :  { %2697 = vrcp.f32 %v1191_v57 }
 0x540   :  { %2699 = vrcp.f32 %v1192_v58 }
 0x547   :  { %v2694_v62 = vpop.eup %2693 }
 0x548   :  { %v2696_v0 = vpop.eup %2695  ;;  %v1242_v3 = vmul.f32 %v2694_v62, %v1238_v60 }
 0x549   :  { %v2698_v4 = vpop.eup %2697  ;;  %v1243_v6 = vmul.f32 %v2696_v0, %v1239_v63 }
 0x54a   :  { %v2700_v56 = vpop.eup %2699  ;;  %v1258_v10 = vmul.f32 %v2698_v4, %v1254_v1  ;;  %v1244_v17 = vadd.f32 %v1242_v3, %v3071_v7  ;;  %v1248_v20 = vsub.f32 1.0, %v2698_v4 }
 0x54b   :  { %v1259_v18 = vmul.f32 %v2700_v56, %v1255_v5  ;;  %v1245_v19 = vadd.f32 %v1243_v6, %v3073_v14  ;;  %v1249_v22 = vsub.f32 1.0, %v2700_v56 }
 0x54c   :  { %2701 = vtanh.f32 %v1244_v17 }
 0x54d   :  { %2703 = vtanh.f32 %v1245_v19 }
 0x556   :  { %v2702_v21 = vpop.eup %2701 }
 0x557   :  { %v2704_v23 = vpop.eup %2703  ;;  %v1250_v8 = vmul.f32 %v2702_v21, %v1248_v20 }
 0x558   :  { %v1251_v9 = vmul.f32 %v2704_v23, %v1249_v22 }
 0x559   :  { %v3243_v24 = vadd.f32 %v1258_v10, %v1250_v8 }
 0x55a   :  { %v3245_v43 = vadd.f32 %v1259_v18, %v1251_v9 }
 0x55b   :  { %1263 = vst.msk [vmem:[#allocation2] sm:$0x10] %vm1262_vm9, %v3243_v24  ;;  %v1265_v25 = vpack.c.bf16 %v3243_v24, %v3243_v24  ;;  %v1453_v20 = vrot.slane %v3243_v24, 7 }
 0x55c   :  { %1264 = vst.msk [vmem:[#allocation2 + $0x8] sm:$0x10] %vm1262_vm9, %v3245_v43  ;;  %v1266_v27 = vpack.c.bf16 %v3245_v43, %v3245_v43  ;;  %v1454_v23 = vrot.slane %v3245_v43, 7 }
 0x55d   :  { %v1269_v11 = vunpack.c.l.b16 %v1265_v25 }
 0x55e   :  { %v1270_v28 = vunpack.c.l.b16 %v1266_v27 }
 0x55f   :  { %v1271_v30 = vrot.slane %v1269_v11, 4 }
 0x560   :  { %v1272_v31 = vrot.slane %v1270_v28, 3 }
 0x562   :  { %v1273_v34 = vsel %vm480_vm4, %v1272_v31, %v1271_v30 }
 0x563   :  { %v1274_v35 = vpack.c.b16 %v1273_v34, %v1273_v34 }
 0x565   :  { %2502 = vmatmul.mubr.msk.bf16.vlgmr.msra.gmra.mrb[36].mxu0 %vm262_vm5, %v1274_v35  ;;  %2510 = vmatmul.mubr.msk.bf16.vlgmr.msra.gmra.mrb[36].mxu1 %vm262_vm5, %v1274_v35 }
 0x566   :  { %2514 = vmatpush3.bf16.msra.mxu0 %v3007_v13  ;;  %2517 = vmatprep.mubr.msk.bf16.mxu0 %vm2831_vm2, %v2830_v2  ;;  %v3274_v13 = vld [vmem:[%s3508_s2 + $0x8] sm:$0xff]  }
 0x567   :  { %2515 = vmatprep.subr.bf16.mxu0 %v2830_v2  ;;  %2522 = vmatpush3.bf16.msra.mxu1 %v3263_v12 }
 0x568   :  { %2523 = vmatprep.subr.bf16.mxu1 %v2830_v2  ;;  %2525 = vmatprep.mubr.msk.bf16.mxu1 %vm2831_vm2, %v2830_v2 }
 0x56a   :  { %2516 = vmatpush3.bf16.msra.mxu0 %v3023_v16 }
 0x56b   :  { %2529 = vmatprep.subr.bf16.mxu0 %v2830_v2  ;;  %2524 = vmatpush3.bf16.msra.mxu1 %v3274_v13 }
 0x56c   :  { %2537 = vmatprep.subr.bf16.mxu1 %v2830_v2 }
 0x56d   :  { %2518 = vmatmul.mubr.msk.bf16.vlgmr.msra.gmra.mrb[40].mxu0 %vm262_vm5, %v1274_v35 }
 0x56e   :  { %2530 = vmatpush3.bf16.msra.mxu0 %v3282_v36  ;;  %2533 = vmatprep.mubr.msk.bf16.mxu0 %vm2831_vm2, %v2830_v2 }
 0x56f   :  { %2531 = vmatprep.subr.bf16.mxu0 %v2830_v2 }
 0x572   :  { %2532 = vmatpush3.bf16.msra.mxu0 %v3014_v15 }
 0x573   :  { %2545 = vmatprep.subr.bf16.mxu0 %v2830_v2 }
 0x638   :  { %v1312_v16 = vpop.f32.mrb[36].mxu0  ;;  %v1352_v37 = vpop.f32.mrb[36].mxu1 }
 0x639   :  { %v1359_v38 = vrot.slane %v1312_v16, 3  ;;  %v1360_v39 = vrot.slane %v1312_v16, 4  ;;  %v1378_v33 = vrot.slane %v1352_v37, 3  ;;  %v1379_v40 = vrot.slane %v1352_v37, 4  ;;  %v2503_v41 = vpop.f32.mrb[37].mxu0  ;;  %v2511_v45 = vpop.f32.mrb[37].mxu1 }
 0x63a   :  { %v1315_v46 = vpop.f32.mrb[38].mxu0  ;;  %v1355_v47 = vpop.f32.mrb[38].mxu1 }
 0x63b   :  { %v1363_v48 = vadd.f32 %v1359_v38, %v3047_v26  ;;  %v1364_v49 = vadd.f32 %v1360_v39, %v3049_v29  ;;  %v1382_v50 = vadd.f32 %v1378_v33, %v3056_v42  ;;  %v1383_v15 = vadd.f32 %v1379_v40, %v3058_v44  ;;  %v2504_v51 = vpop.f32.mrb[39].mxu0  ;;  %v2512_v52 = vpop.f32.mrb[39].mxu1  ;;  %v3315_v47 = vld [vmem:[%s3511_s6] sm:$0xff]  }
 0x63d   :  { %v2242_v53 = vmul.f32 -1.442695, %v1363_v48  ;;  %v2243_v54 = vmul.f32 -1.442695, %v1364_v49  ;;  %v2244_v55 = vmul.f32 -1.442695, %v1382_v50 }
 0x63e   :  { %v2245_v32 = vmul.f32 -1.442695, %v1383_v15  ;;  %v3328_v48 = vld [vmem:[%s3511_s6 + $0x8] sm:$0xff]  }
 0x63f   :  { %2705 = vpow2.f32 %v2242_v53 }
 0x640   :  { %2707 = vpow2.f32 %v2243_v54  ;;  %v1430_v57 = vpop.f32.mrb[40].mxu0 }
 0x641   :  { %2709 = vpow2.f32 %v2244_v55  ;;  %v2519_v58 = vpop.f32.mrb[41].mxu0  ;;  %v1431_v56 = vadd.f32 %v3065_v61, %v1430_v57 }
 0x642   :  { %2711 = vpow2.f32 %v2245_v32  ;;  %v1433_v59 = vpop.f32.mrb[42].mxu0 }
 0x643   :  { %v2520_v60 = vpop.f32.mrb[43].mxu0  ;;  %v1437_v10 = vrot.slane %v1431_v56, 3  ;;  %v1438_v18 = vrot.slane %v1431_v56, 4 }
 0x649   :  { %v2706_v62 = vpop.eup %2705 }
 0x64a   :  { %v2708_v63 = vpop.eup %2707  ;;  %v1371_v0 = vadd.f32 1.0, %v2706_v62 }
 0x64b   :  { %v2710_v1 = vpop.eup %2709  ;;  %v1372_v3 = vadd.f32 1.0, %v2708_v63 }
 0x64c   :  { %v2712_v4 = vpop.eup %2711  ;;  %2713 = vrcp.f32 %v1371_v0  ;;  %v1390_v5 = vadd.f32 1.0, %v2710_v1 }
 0x64d   :  { %2715 = vrcp.f32 %v1372_v3  ;;  %v1391_v6 = vadd.f32 1.0, %v2712_v4 }
 0x64e   :  { %2717 = vrcp.f32 %v1390_v5 }
 0x64f   :  { %2719 = vrcp.f32 %v1391_v6 }
 0x656   :  { %v2714_v17 = vpop.eup %2713 }
 0x657   :  { %v2716_v19 = vpop.eup %2715  ;;  %v1441_v21 = vmul.f32 %v2714_v17, %v1437_v10 }
 0x658   :  { %v2718_v22 = vpop.eup %2717  ;;  %v1442_v8 = vmul.f32 %v2716_v19, %v1438_v18 }
 0x659   :  { %v2720_v9 = vpop.eup %2719  ;;  %v1457_v25 = vmul.f32 %v2718_v22, %v1453_v20  ;;  %v1443_v27 = vadd.f32 %v1441_v21, %v3071_v7  ;;  %v1447_v61 = vsub.f32 1.0, %v2718_v22 }
 0x65a   :  { %v1458_v11 = vmul.f32 %v2720_v9, %v1454_v23  ;;  %v1444_v28 = vadd.f32 %v1442_v8, %v3073_v14  ;;  %v1448_v31 = vsub.f32 1.0, %v2720_v9  ;;  %v3350_v8 = vld [vmem:[%s3481_s10] ss:$0 sm:$0xff] }
 0x65b   :  { %2721 = vtanh.f32 %v1443_v27 }
 0x65c   :  { %2723 = vtanh.f32 %v1444_v28 }
 0x665   :  { %v2722_v30 = vpop.eup %2721 }
 0x666   :  { %v2724_v34 = vpop.eup %2723  ;;  %v1449_v35 = vmul.f32 %v2722_v30, %v1447_v61 }
 0x667   :  { %v1450_v24 = vmul.f32 %v2724_v34, %v1448_v31 }
 0x668   :  { %v3299_v16 = vadd.f32 %v1457_v25, %v1449_v35 }
 0x669   :  { %v3301_v43 = vadd.f32 %v1458_v11, %v1450_v24 }
 0x66a   :  { %1462 = vst.msk [vmem:[#allocation2] sm:$0x20] %vm1461_vm10, %v3299_v16  ;;  %v1464_v37 = vpack.c.bf16 %v3299_v16, %v3299_v16  ;;  %v1652_v61 = vrot.slane %v3299_v16, 7 }
 0x66b   :  { %1463 = vst.msk [vmem:[#allocation2 + $0x8] sm:$0x20] %vm1461_vm10, %v3301_v43  ;;  %v1465_v38 = vpack.c.bf16 %v3301_v43, %v3301_v43  ;;  %v1653_v34 = vrot.slane %v3301_v43, 7 }
 0x66c   :  { %v1468_v39 = vunpack.c.l.b16 %v1464_v37 }
 0x66d   :  { %v1469_v33 = vunpack.c.l.b16 %v1465_v38 }
 0x66e   :  { %v1470_v40 = vrot.slane %v1468_v39, 5 }
 0x66f   :  { %v1471_v41 = vrot.slane %v1469_v33, 4 }
 0x671   :  { %v1472_v45 = vsel %vm480_vm4, %v1471_v41, %v1470_v40 }
 0x672   :  { %v1473_v46 = vpack.c.b16 %v1472_v45, %v1472_v45 }
 0x674   :  { %2526 = vmatmul.mubr.msk.bf16.vlgmr.msra.gmra.mrb[40].mxu1 %vm262_vm5, %v1473_v46  ;;  %2534 = vmatmul.mubr.msk.bf16.vlgmr.msra.gmra.mrb[44].mxu0 %vm262_vm5, %v1473_v46 }
 0x675   :  { %2538 = vmatpush3.bf16.msra.mxu1 %v3315_v47  ;;  %2541 = vmatprep.mubr.msk.bf16.mxu1 %vm2831_vm2, %v2830_v2 }
 0x676   :  { %2539 = vmatprep.subr.bf16.mxu1 %v2830_v2  ;;  %2546 = vmatpush3.bf16.msra.mxu0 %v3263_v12  ;;  %v2778_v12 = vld [vmem:[%s3510_s23 + $0x8] sm:$0xff]  }
 0x677   :  { %2547 = vmatprep.subr.bf16.mxu0 %v2830_v2  ;;  %2549 = vmatprep.mubr.msk.bf16.mxu0 %vm2831_vm2, %v2830_v2 }
 0x679   :  { %2540 = vmatpush3.bf16.msra.mxu1 %v3328_v48 }
 0x67a   :  { %2553 = vmatprep.subr.bf16.mxu1 %v2830_v2  ;;  %2548 = vmatpush3.bf16.msra.mxu0 %v3274_v13 }
 0x67b   :  { %2561 = vmatprep.subr.bf16.mxu0 %v2830_v2 }
 0x67c   :  { %2542 = vmatmul.mubr.msk.bf16.vlgmr.msra.gmra.mrb[44].mxu1 %vm262_vm5, %v1473_v46 }
 0x67d   :  { %2554 = vmatpush3.bf16.msra.mxu1 %v3282_v36  ;;  %2557 = vmatprep.mubr.msk.bf16.mxu1 %vm2831_vm2, %v2830_v2 }
 0x67e   :  { %2555 = vmatprep.subr.bf16.mxu1 %v2830_v2 }
 0x681   :  { %2556 = vmatpush3.bf16.msra.mxu1 %v2778_v12 }
 0x682   :  { %2569 = vmatprep.subr.bf16.mxu1 %v2830_v2 }
 0x747   :  { %v1511_v49 = vpop.f32.mrb[40].mxu1  ;;  %v1551_v13 = vpop.f32.mrb[44].mxu0 }
 0x748   :  { %v1558_v50 = vrot.slane %v1511_v49, 2  ;;  %v1559_v15 = vrot.slane %v1511_v49, 3  ;;  %v1577_v51 = vrot.slane %v1551_v13, 2  ;;  %v1578_v52 = vrot.slane %v1551_v13, 3  ;;  %v2527_v53 = vpop.f32.mrb[41].mxu1  ;;  %v2535_v36 = vpop.f32.mrb[45].mxu0 }
 0x749   :  { %v1514_v54 = vpop.f32.mrb[42].mxu1  ;;  %v1554_v55 = vpop.f32.mrb[46].mxu0 }
 0x74a   :  { %v1562_v32 = vadd.f32 %v1558_v50, %v3047_v26  ;;  %v1563_v57 = vadd.f32 %v1559_v15, %v3049_v29  ;;  %v1581_v58 = vadd.f32 %v1577_v51, %v3056_v42  ;;  %v1582_v59 = vadd.f32 %v1578_v52, %v3058_v44  ;;  %v2528_v60 = vpop.f32.mrb[43].mxu1  ;;  %v2536_v62 = vpop.f32.mrb[47].mxu0  ;;  %v2603_v55 = vld [vmem:[%s3482_s11 + $0x8] sm:$0xff]  }
 0x74c   :  { %v2249_v63 = vmul.f32 -1.442695, %v1562_v32  ;;  %v2250_v0 = vmul.f32 -1.442695, %v1563_v57  ;;  %v2251_v1 = vmul.f32 -1.442695, %v1581_v58 }
 0x74d   :  { %v2252_v3 = vmul.f32 -1.442695, %v1582_v59 }
 0x74e   :  { %2725 = vpow2.f32 %v2249_v63 }
 0x74f   :  { %2727 = vpow2.f32 %v2250_v0  ;;  %v1629_v4 = vpop.f32.mrb[44].mxu1 }
 0x750   :  { %2729 = vpow2.f32 %v2251_v1  ;;  %v2543_v5 = vpop.f32.mrb[45].mxu1  ;;  %v1630_v9 = vadd.f32 %v3350_v8, %v1629_v4 }
 0x751   :  { %2731 = vpow2.f32 %v2252_v3  ;;  %v1632_v6 = vpop.f32.mrb[46].mxu1 }
 0x752   :  { %v2544_v56 = vpop.f32.mrb[47].mxu1  ;;  %v1636_v25 = vrot.slane %v1630_v9, 2  ;;  %v1637_v11 = vrot.slane %v1630_v9, 3 }
 0x758   :  { %v2726_v10 = vpop.eup %2725 }
 0x759   :  { %v2728_v17 = vpop.eup %2727  ;;  %v1570_v18 = vadd.f32 1.0, %v2726_v10 }
 0x75a   :  { %v2730_v19 = vpop.eup %2729  ;;  %v1571_v20 = vadd.f32 1.0, %v2728_v17 }
 0x75b   :  { %v2732_v21 = vpop.eup %2731  ;;  %2733 = vrcp.f32 %v1570_v18  ;;  %v1589_v22 = vadd.f32 1.0, %v2730_v19 }
 0x75c   :  { %2735 = vrcp.f32 %v1571_v20  ;;  %v1590_v23 = vadd.f32 1.0, %v2732_v21 }
 0x75d   :  { %2737 = vrcp.f32 %v1589_v22 }
 0x75e   :  { %2739 = vrcp.f32 %v1590_v23 }
 0x765   :  { %v2734_v27 = vpop.eup %2733 }
 0x766   :  { %v2736_v28 = vpop.eup %2735  ;;  %v1640_v30 = vmul.f32 %v2734_v27, %v1636_v25 }
 0x767   :  { %v2738_v31 = vpop.eup %2737  ;;  %v1641_v35 = vmul.f32 %v2736_v28, %v1637_v11 }
 0x768   :  { %v2740_v24 = vpop.eup %2739  ;;  %v1656_v37 = vmul.f32 %v2738_v31, %v1652_v61  ;;  %v1642_v38 = vadd.f32 %v1640_v30, %v3071_v7  ;;  %v1646_v40 = vsub.f32 1.0, %v2738_v31 }
 0x769   :  { %v1657_v39 = vmul.f32 %v2740_v24, %v1653_v34  ;;  %v1643_v33 = vadd.f32 %v1641_v35, %v3073_v14  ;;  %v1647_v45 = vsub.f32 1.0, %v2740_v24 }
 0x76a   :  { %2741 = vtanh.f32 %v1642_v38 }
 0x76b   :  { %2743 = vtanh.f32 %v1643_v33 }
 0x774   :  { %v2742_v41 = vpop.eup %2741 }
 0x775   :  { %v2744_v46 = vpop.eup %2743  ;;  %v1648_v12 = vmul.f32 %v2742_v41, %v1646_v40 }
 0x776   :  { %v1649_v16 = vmul.f32 %v2744_v46, %v1647_v45 }
 0x777   :  { %v3357_v49 = vadd.f32 %v1656_v37, %v1648_v12 }
 0x778   :  { %v3359_v43 = vadd.f32 %v1657_v39, %v1649_v16 }
 0x779   :  { %1661 = vst.msk [vmem:[#allocation2] sm:$0x40] %vm1660_vm11, %v3357_v49  ;;  %v1663_v13 = vpack.c.bf16 %v3357_v49, %v3357_v49  ;;  %v1851_v24 = vrot.slane %v3357_v49, 7 }
 0x77a   :  { %1662 = vst.msk [vmem:[#allocation2 + $0x8] sm:$0x40] %vm1660_vm11, %v3359_v43  ;;  %v1664_v50 = vpack.c.bf16 %v3359_v43, %v3359_v43  ;;  %v1852_v39 = vrot.slane %v3359_v43, 7 }
 0x77b   :  { %v1667_v15 = vunpack.c.l.b16 %v1663_v13 }
 0x77c   :  { %v1668_v51 = vunpack.c.l.b16 %v1664_v50 }
 0x77d   :  { %v1669_v52 = vrot.slane %v1667_v15, 6 }
 0x77e   :  { %v1670_v53 = vrot.slane %v1668_v51, 5 }
 0x780   :  { %v1671_v36 = vsel %vm480_vm4, %v1670_v53, %v1669_v52 }
 0x781   :  { %v1672_v54 = vpack.c.b16 %v1671_v36, %v1671_v36  ;;  %v1989_v36 = vld [vmem:[%s3486_s15] sm:$0xf] }
 0x783   :  { %2550 = vmatmul.mubr.msk.bf16.vlgmr.msra.gmra.mrb[48].mxu0 %vm262_vm5, %v1672_v54  ;;  %2558 = vmatmul.mubr.msk.bf16.vlgmr.msra.gmra.mrb[48].mxu1 %vm262_vm5, %v1672_v54 }
 0x784   :  { %2562 = vmatpush3.bf16.msra.mxu0 %v3315_v47  ;;  %2565 = vmatprep.mubr.msk.bf16.mxu0 %vm2831_vm2, %v2830_v2  ;;  %v2602_v47 = vld [vmem:[%s3482_s11] sm:$0xff]  }
 0x785   :  { %2563 = vmatprep.subr.bf16.mxu0 %v2830_v2  ;;  %2573 = vmatprep.mubr.msk.bf16.mxu1 %vm2831_vm2, %v2830_v2 }
 0x786   :  { %2570 = vmatpush3.bf16.msra.mxu1 %v2602_v47  ;;  %v2261_v47 = vld [vmem:[%s3483_s12] ss:$0 sm:$0xff] }
 0x787   :  { %2571 = vmatprep.subr.bf16.mxu1 %v2830_v2 }
 0x788   :  { %2564 = vmatpush3.bf16.msra.mxu0 %v3328_v48 }
 0x789   :  { %2577 = vmatprep.subr.bf16.mxu0 %v2830_v2 }
 0x78a   :  { %2572 = vmatpush3.bf16.msra.mxu1 %v2603_v55 }
 0x78b   :  { %2566 = vmatmul.mubr.msk.bf16.vlgmr.msra.gmra.mrb[52].mxu0 %vm262_vm5, %v1672_v54  ;;  %2583 = vmatprep.subr.bf16.mxu1 %v2830_v2  ;;  %v2001_v54 = vsel %vm88_vm0, %v1989_v36, 0 }
 0x78c   :  { %2579 = vmatprep.mubr.msk.bf16.mxu0 %vm2831_vm2, %v2830_v2  ;;  %2578 = vmatpush3.bf16.msra.mxu0 %v2001_v54 }
 0x856   :  { %v1710_v48 = vpop.f32.mrb[48].mxu0  ;;  %v1750_v32 = vpop.f32.mrb[48].mxu1 }
 0x857   :  { %v1757_v57 = vrot.slane %v1710_v48, 1  ;;  %v1758_v58 = vrot.slane %v1710_v48, 2  ;;  %v1776_v59 = vrot.slane %v1750_v32, 1  ;;  %v1777_v60 = vrot.slane %v1750_v32, 2  ;;  %v2551_v62 = vpop.f32.mrb[49].mxu0  ;;  %v2559_v63 = vpop.f32.mrb[49].mxu1 }
 0x858   :  { %v1713_v0 = vpop.f32.mrb[50].mxu0  ;;  %v1753_v1 = vpop.f32.mrb[50].mxu1  ;;  %v2781_v62 = vld [vmem:[%s3507_s5 + $0x8] sm:$0xff] }
 0x859   :  { %v1761_v3 = vadd.f32 %v1757_v57, %v3047_v26  ;;  %v1762_v4 = vadd.f32 %v1758_v58, %v3049_v29  ;;  %v1780_v5 = vadd.f32 %v1776_v59, %v3056_v42  ;;  %v1781_v6 = vadd.f32 %v1777_v60, %v3058_v44  ;;  %v2552_v56 = vpop.f32.mrb[51].mxu0  ;;  %v2560_v10 = vpop.f32.mrb[51].mxu1  ;;  %v2780_v58 = vld [vmem:[%s3507_s5] sm:$0xff] }
 0x85b   :  { %v2256_v17 = vmul.f32 -1.442695, %v1761_v3  ;;  %v2257_v18 = vmul.f32 -1.442695, %v1762_v4  ;;  %v2258_v19 = vmul.f32 -1.442695, %v1780_v5 }
 0x85c   :  { %v2259_v20 = vmul.f32 -1.442695, %v1781_v6 }
 0x85d   :  { %2745 = vpow2.f32 %v2256_v17 }
 0x85e   :  { %2747 = vpow2.f32 %v2257_v18  ;;  %v1828_v21 = vpop.f32.mrb[52].mxu0 }
 0x85f   :  { %2749 = vpow2.f32 %v2258_v19  ;;  %v2567_v22 = vpop.f32.mrb[53].mxu0  ;;  %v1829_v61 = vadd.f32 %v3350_v8, %v1828_v21 }
 0x860   :  { %2751 = vpow2.f32 %v2259_v20  ;;  %v1831_v23 = vpop.f32.mrb[54].mxu0 }
 0x861   :  { %v2568_v26 = vpop.f32.mrb[55].mxu0  ;;  %v1835_v30 = vrot.slane %v1829_v61, 1  ;;  %v1836_v34 = vrot.slane %v1829_v61, 2 }
 0x867   :  { %v2746_v9 = vpop.eup %2745 }
 0x868   :  { %v2748_v29 = vpop.eup %2747  ;;  %v1769_v25 = vadd.f32 1.0, %v2746_v9 }
 0x869   :  { %v2750_v42 = vpop.eup %2749  ;;  %v1770_v27 = vadd.f32 1.0, %v2748_v29 }
 0x86a   :  { %v2752_v44 = vpop.eup %2751  ;;  %2753 = vrcp.f32 %v1769_v25  ;;  %v1788_v11 = vadd.f32 1.0, %v2750_v42 }
 0x86b   :  { %2755 = vrcp.f32 %v1770_v27  ;;  %v1789_v28 = vadd.f32 1.0, %v2752_v44 }
 0x86c   :  { %2757 = vrcp.f32 %v1788_v11 }
 0x86d   :  { %2759 = vrcp.f32 %v1789_v28 }
 0x874   :  { %v2754_v31 = vpop.eup %2753 }
 0x875   :  { %v2756_v35 = vpop.eup %2755  ;;  %v1839_v37 = vmul.f32 %v2754_v31, %v1835_v30  ;;  %v2265_v31 = vld [vmem:[%s3484_s13] ss:$0 sm:$0xff] }
 0x876   :  { %v2758_v38 = vpop.eup %2757  ;;  %v1840_v33 = vmul.f32 %v2756_v35, %v1836_v34 }
 0x877   :  { %v2760_v40 = vpop.eup %2759  ;;  %v1855_v41 = vmul.f32 %v2758_v38, %v1851_v24  ;;  %v1841_v45 = vadd.f32 %v1839_v37, %v3071_v7  ;;  %v1845_v8 = vsub.f32 1.0, %v2758_v38  ;;  %v2266_v24 = vld [vmem:[%s3485_s14] ss:$0 sm:$0xff]  ;;  %s2833_s14 = smov [#allocation5]  }
 0x878   :  { %v1856_v46 = vmul.f32 %v2760_v40, %v1852_v39  ;;  %v1842_v12 = vadd.f32 %v1840_v33, %v3073_v14  ;;  %v1846_v13 = vsub.f32 1.0, %v2760_v40 }
 0x879   :  { %2761 = vtanh.f32 %v1841_v45  ;;  %v2267_v45 = vld [vmem:[%s3487_s16] ss:$0 sm:$0xff]  ;;  %s2183_s16 = sshll.u32 %s2833_s14, 4  ;;  %s2184_s16 = int_to_ptr.vmem [resolvable:$true] %s2183_s16 }
 0x87a   :  { %2763 = vtanh.f32 %v1842_v12  ;;  %p2787_p1 = scmp.lt.s32.totalorder %s2184_s16, %s2184_s16 }
 0x883   :  { %v2762_v16 = vpop.eup %2761 }
 0x884   :  { %v2764_v50 = vpop.eup %2763  ;;  %v1847_v15 = vmul.f32 %v2762_v16, %v1845_v8 }
 0x885   :  { %v1848_v49 = vmul.f32 %v2764_v50, %v1846_v13 }
 0x886   :  { %v1857_v51 = vadd.f32 %v1855_v41, %v1847_v15  ;;  %v2604_v41 = vld [vmem:[%s3488_s17] sm:$0xff]   ;;  %s2782_s17 = scalar_lea.vmem %s2184_s16, 32 }
 0x887   :  { %v1858_v52 = vadd.f32 %v1856_v46, %v1848_v49  ;;  %p2783_p0 = scmp.ne.s32.totalorder %s2184_s16, %s2782_s17  ;;  %p2788_p2 = scmp.lt.s32.totalorder %s2782_s17, %s2782_s17 }
 0x888   :  { %1860 = vst.msk [vmem:[#allocation2] sm:$0x80] %vm1859_vm12, %v1857_v51  ;;  %1867 = vst.msk [vmem:[#allocation5 - $0x7] sm:$0x80] %vm1859_vm12, %v1857_v51 }
 0x889   :  { %1861 = vst.msk [vmem:[#allocation2 + $0x8] sm:$0x80] %vm1859_vm12, %v1858_v52  ;;  %v1864_v43 = vrot.slane %v1858_v52, 7  ;;  %p2789_p3 = por %p2788_p2, %p2787_p1 }
 0x88b   :  { %1868 = vst.msk [vmem:[#allocation5 + $0x1] sm:$0x1] %vm470_vm3, %v1864_v43  ;;  %p2790_p4 = pnand %p2789_p3, %p2783_p0 }
 0x88f   :  { %v1869_v7 = vld [vmem:[#allocation2] sm:$0xff] }
 0x890   :  { %v1870_v53 = vld [vmem:[#allocation2 + $0x8] sm:$0xff] }
 0x891   :  { %v1871_v14 = vpack.c.bf16 %v1870_v53, %v1869_v7 }
 0x893   :  { %2574 = vmatmul.mubr.msk.bf16.vlgmr.msra.gmra.mrb[52].mxu1 %vm262_vm5, %v1871_v14 }
 0x894   :  { %2585 = vmatprep.mubr.msk.bf16.mxu1 %vm2831_vm2, %v2830_v2  ;;  %2584 = vmatpush3.bf16.msra.mxu1 %v2604_v41 }
 0x966   :  { %v1932_v55 = vpop.f32.mrb[52].mxu1 }
 0x967   :  { %v1933_v48 = vadd.f32 %v2261_v47, %v1932_v55  ;;  %v2575_v32 = vpop.f32.mrb[53].mxu1 }
 0x968   :  { %v1935_v57 = vpop.f32.mrb[54].mxu1 }
 0x969   :  { %v1939_v2 = vadd.f32 %v2780_v58, %v1933_v48  ;;  %v1936_v59 = vadd.f32 %v2261_v47, %v1935_v57  ;;  %v2576_v60 = vpop.f32.mrb[55].mxu1 }
 0x96b   :  { %v1940_v63 = vadd.f32 %v2781_v62, %v1936_v59  ;;  %v1941_v0 = vsel %vm84_vm1, %v1939_v2, 0.0 }
 0x96d   :  { %v1942_v1 = vsel %vm84_vm1, %v1940_v63, 0.0 }
 0x96e   :  { %v1943_v3 = vadd.f32 %v1942_v1, %v1941_v0 }
 0x970   :  { %v1944_v4 = vrot.slane %v1943_v3, 4 }
 0x972   :  { %v1945_v5 = vadd.f32 %v1944_v4, %v1943_v3 }
 0x974   :  { %v1946_v6 = vrot.slane %v1945_v5, 2 }
 0x976   :  { %v1947_v56 = vadd.f32 %v1946_v6, %v1945_v5 }
 0x978   :  { %v1948_v10 = vrot.slane %v1947_v56, 1 }
 0x97a   :  { %v1949_v17 = vadd.f32 %v1948_v10, %v1947_v56 }
 0x97c   :  { %v1951_v18 = vmul.f32 0.0625, %v1949_v17 }
 0x97e   :  { %v1952_v19 = vsub.f32 %v1939_v2, %v1951_v18  ;;  %v1953_v20 = vsub.f32 %v1940_v63, %v1951_v18 }
 0x980   :  { %v1954_v21 = vmul.f32 %v1952_v19, %v1952_v19  ;;  %v1955_v22 = vmul.f32 %v1953_v20, %v1953_v20 }
 0x982   :  { %v1956_v23 = vsel %vm84_vm1, %v1954_v21, 0.0  ;;  %v1957_v26 = vsel %vm84_vm1, %v1955_v22, 0.0 }
 0x983   :  { %v1958_v9 = vadd.f32 %v1957_v26, %v1956_v23 }
 0x985   :  { %v1959_v29 = vrot.slane %v1958_v9, 4 }
 0x987   :  { %v1960_v25 = vadd.f32 %v1959_v29, %v1958_v9 }
 0x989   :  { %v1961_v42 = vrot.slane %v1960_v25, 2 }
 0x98b   :  { %v1962_v27 = vadd.f32 %v1961_v42, %v1960_v25 }
 0x98d   :  { %v1963_v44 = vrot.slane %v1962_v27, 1 }
 0x98f   :  { %v1964_v11 = vadd.f32 %v1963_v44, %v1962_v27 }
 0x991   :  { %v1965_v28 = vmul.f32 0.0625, %v1964_v11 }
 0x993   :  { %v1966_v61 = vadd.f32 1e-05, %v1965_v28 }
 0x995   :  { %2765 = vrsqrt.f32 %v1966_v61 }
 0x99f   :  { %v2766_v30 = vpop.eup %2765 }
 0x9a0   :  { %v1968_v34 = vmul.f32 %v2766_v30, %v1952_v19  ;;  %v1969_v35 = vmul.f32 %v2766_v30, %v1953_v20 }
 0x9a2   :  { %v1977_v37 = vmul.f32 %v2265_v31, %v1968_v34  ;;  %v1978_v38 = vmul.f32 %v2265_v31, %v1969_v35 }
 0x9a4   :  { %v1986_v39 = vadd.f32 %v2266_v24, %v1977_v37  ;;  %v1987_v33 = vadd.f32 %v2266_v24, %v1978_v38 }
 0x9a6   :  { %v1988_v40 = vpack.c.bf16 %v1987_v33, %v1986_v39 }
 0x9a8   :  { %2580 = vmatmul.mubr.msk.bf16.vlgmr.msra.gmra.mrb[56].mxu0 %vm84_vm1, %v1988_v40 }
 0xa7b   :  { %v2037_v46 = vpop.f32.mrb[56].mxu0 }
 0xa7c   :  { %v2038_v12 = vadd.f32 %v2267_v45, %v2037_v46  ;;  %v2581_v8 = vpop.f32.mrb[57].mxu0 }
 0xa7d   :  { %v2040_v16 = vpop.f32.mrb[58].mxu0 }
 0xa7e   :  { %v2046_v13 = vmul.f32 0.70710677, %v2038_v12  ;;  %v2041_v50 = vadd.f32 %v2267_v45, %v2040_v16  ;;  %v2582_v15 = vpop.f32.mrb[59].mxu0  ;;  %v2044_v7 = vmul.f32 0.5, %v2038_v12 }
 0xa80   :  { %2767 = verf.f32 %v2046_v13  ;;  %v2047_v49 = vmul.f32 0.70710677, %v2041_v50  ;;  %v2045_v53 = vmul.f32 0.5, %v2041_v50 }
 0xa82   :  { %2769 = verf.f32 %v2047_v49 }
 0xa8a   :  { %v2768_v51 = vpop.eup %2767 }
 0xa8b   :  { %v2050_v52 = vadd.f32 1.0, %v2768_v51 }
 0xa8c   :  { %v2770_v43 = vpop.eup %2769 }
 0xa8d   :  { %v2051_v14 = vadd.f32 1.0, %v2770_v43  ;;  %v2052_v36 = vmul.f32 %v2050_v52, %v2044_v7 }
 0xa8f   :  { %v2053_v54 = vmul.f32 %v2051_v14, %v2045_v53 }
 0xa91   :  { %v2054_v47 = vpack.c.bf16 %v2053_v54, %v2052_v36 }
 0xa93   :  { %2586 = vmatmul.mubr.msk.bf16.vlgmr.msra.gmra.mrb[56].mxu1 %vm2070_vm13, %v2054_v47 }
 0xa94   :  { %2793 = shalt.err (!%p2790_p4)
}
 0xa95   :  { %s2794_s8 = scalar_lea.hbm %s3493_s22, 32 }
 0xa96   :  { %p2795_p5 = scmp.ne.s32.totalorder %s3493_s22, %s2794_s8  ;;  %p2798_p6 = scmp.lt.u32.totalorder %s2794_s8, %s3493_s22 }
 0xa98   :  { %p2800_p7 = pnand %p2798_p6, %p2795_p5 }
 0xa9a   :  { %2803 = shalt.err (!%p2800_p7)
}
 0xa9b   :  { %2186 = dma.vmem_to_hbm [thread:$0]  %s2184_s16, 32, %s3493_s22, [#allocation6]   ;;  %v2269_v55 = vld [vmem:[%s3489_s18] ss:$0 sm:$0xff] }
 0xa9c   :  { %v2272_v30 = vld [vmem:[%s3490_s19] ss:$0 sm:$0xff]  ;;  %s2834_s3 = smov [#allocation3]  }
 0xa9d   :  { %v2273_v35 = vld [vmem:[%s3491_s20] ss:$0 sm:$0xff]  ;;  %s2170_s15 = sshll.u32 %s2834_s3, 4  ;;  %s2171_s15 = int_to_ptr.vmem [resolvable:$true] %s2170_s15 }
 0xa9e   :  { %s2804_s12 = scalar_lea.vmem %s2171_s15, 256  ;;  %p2809_p9 = scmp.lt.s32.totalorder %s2171_s15, %s2171_s15 }
 0xa9f   :  { %p2805_p8 = scmp.ne.s32.totalorder %s2171_s15, %s2804_s12  ;;  %p2810_p10 = scmp.lt.s32.totalorder %s2804_s12, %s2804_s12 }
 0xaa1   :  { %p2811_p11 = por %p2810_p10, %p2809_p9 }
 0xaa3   :  { %p2812_p12 = pnand %p2811_p11, %p2805_p8 }
 0xb66   :  { %v2108_v48 = vpop.f32.mrb[56].mxu1 }
 0xb67   :  { %v2109_v32 = vadd.f32 %v2269_v55, %v2108_v48  ;;  %v2587_v57 = vpop.f32.mrb[57].mxu1 }
 0xb68   :  { %v2111_v58 = vpop.f32.mrb[58].mxu1 }
 0xb69   :  { %v2115_v2 = vadd.f32 %v2109_v32, %v1986_v39  ;;  %v2112_v59 = vadd.f32 %v2269_v55, %v2111_v58  ;;  %v2588_v60 = vpop.f32.mrb[59].mxu1 }
 0xb6b   :  { %v2116_v62 = vadd.f32 %v2112_v59, %v1987_v33  ;;  %v2117_v63 = vsel %vm84_vm1, %v2115_v2, 0.0 }
 0xb6d   :  { %v2118_v0 = vsel %vm84_vm1, %v2116_v62, 0.0 }
 0xb6e   :  { %v2119_v1 = vadd.f32 %v2118_v0, %v2117_v63 }
 0xb70   :  { %v2120_v3 = vrot.slane %v2119_v1, 4 }
 0xb72   :  { %v2121_v4 = vadd.f32 %v2120_v3, %v2119_v1 }
 0xb74   :  { %v2122_v5 = vrot.slane %v2121_v4, 2 }
 0xb76   :  { %v2123_v6 = vadd.f32 %v2122_v5, %v2121_v4 }
 0xb78   :  { %v2124_v56 = vrot.slane %v2123_v6, 1 }
 0xb7a   :  { %v2125_v10 = vadd.f32 %v2124_v56, %v2123_v6 }
 0xb7c   :  { %v2126_v17 = vmul.f32 0.0625, %v2125_v10 }
 0xb7e   :  { %v2127_v18 = vsub.f32 %v2115_v2, %v2126_v17  ;;  %v2128_v19 = vsub.f32 %v2116_v62, %v2126_v17 }
 0xb80   :  { %v2129_v20 = vmul.f32 %v2127_v18, %v2127_v18  ;;  %v2130_v21 = vmul.f32 %v2128_v19, %v2128_v19 }
 0xb82   :  { %v2131_v22 = vsel %vm84_vm1, %v2129_v20, 0.0  ;;  %v2132_v23 = vsel %vm84_vm1, %v2130_v21, 0.0 }
 0xb83   :  { %v2133_v26 = vadd.f32 %v2132_v23, %v2131_v22 }
 0xb85   :  { %v2134_v9 = vrot.slane %v2133_v26, 4 }
 0xb87   :  { %v2135_v29 = vadd.f32 %v2134_v9, %v2133_v26 }
 0xb89   :  { %v2136_v25 = vrot.slane %v2135_v29, 2 }
 0xb8b   :  { %v2137_v42 = vadd.f32 %v2136_v25, %v2135_v29 }
 0xb8d   :  { %v2138_v27 = vrot.slane %v2137_v42, 1 }
 0xb8f   :  { %v2139_v44 = vadd.f32 %v2138_v27, %v2137_v42 }
 0xb91   :  { %v2140_v11 = vmul.f32 0.0625, %v2139_v44 }
 0xb93   :  { %v2141_v28 = vadd.f32 1e-05, %v2140_v11 }
 0xb95   :  { %2771 = vrsqrt.f32 %v2141_v28 }
 0xb9f   :  { %v2772_v61 = vpop.eup %2771 }
 0xba0   :  { %v2143_v31 = vmul.f32 %v2772_v61, %v2127_v18  ;;  %v2144_v34 = vmul.f32 %v2772_v61, %v2128_v19 }
 0xba2   :  { %v2153_v24 = vmul.f32 %v2272_v30, %v2144_v34  ;;  %v2152_v37 = vmul.f32 %v2272_v30, %v2143_v31 }
 0xba4   :  { %v2161_v38 = vadd.f32 %v2273_v35, %v2152_v37  ;;  %v2162_v39 = vadd.f32 %v2273_v35, %v2153_v24 }
 0xba6   :  { %2163 = vst.msk [vmem:[#allocation3] sm:$0xff] %vm84_vm1, %v2161_v38  ;;  %2164 = vst.msk [vmem:[#allocation3 + $0x8] sm:$0xff] %vm84_vm1, %v2162_v39 }
 0xba7   :  { %2815 = shalt.err (!%p2812_p12)
}
 0xba8   :  { %s2816_s5 = scalar_lea.hbm %s3492_s21, 256 }
 0xba9   :  { %p2817_p13 = scmp.ne.s32.totalorder %s3492_s21, %s2816_s5  ;;  %p2820_p0 = scmp.lt.u32.totalorder %s2816_s5, %s3492_s21 }
 0xbab   :  { %p2822_p1 = pnand %p2820_p0, %p2817_p13 }
 0xbad   :  { %2825 = shalt.err (!%p2822_p1)
}
 0xbae   :  { %s2835_s30 = smov 128   ;;  %s2836_s13 = smov 8  }
 0xbaf   :  { %2176 = dma.vmem_to_hbm [thread:$0]  %s2171_s15, 256, %s3492_s21, [#allocation4], %s2835_s30, %s2835_s30, %s2836_s13  }
 0xbb0   :  { %2826 = dma.done.wait [#allocation4], 256  }
 0xbb1   :  { %2827 = vsyncadd [#allocation4], 4294967040 }
 0xbb2   :  { %2828 = dma.done.wait [#allocation6], 32  }
 0xbb3   :  { %2829 = vsyncadd [#allocation6], 4294967264 }
 0xbb4   :  { %2193 = vsyncpa [#allocation4], 1 }
 0xbb5   :  { %2194 = vsyncpa [#allocation6], 1 }

</bundles_post_ra>
